<compile_context>
chip_gen: v7x
topology: tpu7x:2x2x1
jax: 0.10.0
libtpu: 0.0.40
codegen_flags: <defaults>
</compile_context>

<pallas_src>
import math

import jax
import jax.numpy as jnp
from jax import lax
from jax.experimental import pallas as pl
from jax.experimental.pallas import tpu as pltpu


# ------------------------- model hyper-parameters (small) -------------------------
B, S = 2, 8            # batch, seqlen
V = 20                 # vocab size
D = 32                 # emb_dim == hid_dim (d_model)
H = 4                  # attention heads
F = 4 * D              # feed-forward width
L = 2                  # encoder layers
T = 5                  # number of tags
TP = 128               # tag dim padded to the 128-lane width
NEG = -10000.0         # "-inf" used for CRF padding / phantom tags
LN_EPS = 1e-5


# -------- shared math helpers (used by both the kernel and the reference) ---------
def _layer_norm(v, g, b):
    mu = jnp.mean(v, axis=-1, keepdims=True)
    var = jnp.mean((v - mu) * (v - mu), axis=-1, keepdims=True)
    return (v - mu) * lax.rsqrt(var + LN_EPS) * g + b


def _gelu(v):
    # TODO(synk): PyTorch's default 'gelu' is the exact erf form; the tanh
    # approximation is used here (erf is not a guaranteed Mosaic primitive).
    c = 0.7978845608028654  # sqrt(2/pi)
    return 0.5 * v * (1.0 + jnp.tanh(c * (v + 0.044715 * v * v * v)))


# ------------------------------ fused Pallas kernel --------------------------------
# Packed parameter layout (host side, see pack_params()):
#   wmat  (L, 3D+F, 128) bf16 : rows 0:D wqkv(96 cols) | D:2D wo(32) | 2D:3D w1(128)
#                               | 3D:3D+F w2(32 cols)
#   vecs  (L, 8, 128)   f32  : row0 bqkv | row1 bo | row2 [ln1g|ln1b|ln2g|ln2b]
#                               | row3 b1 | row4 b2
#   tagw  (D, 128)      bf16 : hidden2tag weight (cols >= T zero)
#   crfp  (16, 128)     f32  : rows 0:8 trans (from padded to 8, to padded to 128,
#                               phantom entries NEG) | row8 start | row9 end
#                               | row10 hidden2tag bias
def transformer_crf_kernel(lens_ref, h_ref, y_ref, wmat_ref, vecs_ref,
                           tagw_ref, crf_ref, out_ref, emis_ref, alpha_ref):
    row = pl.program_id(0)
    s, d = h_ref.shape                       # (8, 32)
    tp = emis_ref.shape[1]                   # 128
    hd = d // H
    scale = 1.0 / math.sqrt(hd)

    # --------------- encoder: 2 post-norm layers, 4-head self-attention ---------------
    x = h_ref[...]                                           # (S, D) f32
    for l in range(L):                                       # static: 2 layers
        wqkv = wmat_ref[l, 0:D, :]                           # (D, 128) bf16
        wo = wmat_ref[l, D:2 * D, 0:D]                       # (D, D)   bf16
        w1 = wmat_ref[l, 2 * D:3 * D, :]                     # (D, F)   bf16
        w2 = wmat_ref[l, 3 * D:3 * D + F, 0:D]               # (F, D)   bf16
        bqkv = vecs_ref[l, 0:1, :]                           # (1, 128) f32
        bo = vecs_ref[l, 1:2, 0:D]
        ln1g = vecs_ref[l, 2:3, 0:D]
        ln1b = vecs_ref[l, 2:3, D:2 * D]
        ln2g = vecs_ref[l, 2:3, 2 * D:3 * D]
        ln2b = vecs_ref[l, 2:3, 3 * D:4 * D]
        b1 = vecs_ref[l, 3:4, 0:F]
        b2 = vecs_ref[l, 4:5, 0:D]

        qkv = jnp.dot(x.astype(jnp.bfloat16), wqkv,
                      preferred_element_type=jnp.float32) + bqkv       # (S, 128)
        ctx = []
        for hh in range(H):                                  # static: 4 heads
            o = hh * hd
            qh = qkv[:, o:o + hd]                            # (S, hd)
            kh = qkv[:, D + o:D + o + hd]
            vh = qkv[:, 2 * D + o:2 * D + o + hd]
            sc = jnp.einsum('qe,ke->qk', qh, kh,
                            preferred_element_type=jnp.float32) * scale  # (S, S)
            sc = sc - jnp.max(sc, axis=-1, keepdims=True)
            pr = jnp.exp(sc)
            pr = pr * pl.reciprocal(jnp.sum(pr, axis=-1, keepdims=True),
                                    approx=True)
            ctx.append(jnp.dot(pr, vh, preferred_element_type=jnp.float32))
        ctx = jnp.concatenate(ctx, axis=1)                   # (S, D) concat heads
        attn = jnp.dot(ctx.astype(jnp.bfloat16), wo,
                       preferred_element_type=jnp.float32) + bo
        x = _layer_norm(x + attn, ln1g, ln1b)

        ff = _gelu(jnp.dot(x.astype(jnp.bfloat16), w1,
                           preferred_element_type=jnp.float32) + b1)    # (S, F)
        ff = jnp.dot(ff.astype(jnp.bfloat16), w2,
                     preferred_element_type=jnp.float32) + b2
        x = _layer_norm(x + ff, ln2g, ln2b)

    # ------------------- hidden2tag (lane-padded emissions, VMEM-resident) ------------
    btag = crf_ref[10:11, :]                                 # (1, 128)
    emis = jnp.dot(x.astype(jnp.bfloat16), tagw_ref[...],
                   preferred_element_type=jnp.float32) + btag           # (S, 128)
    emis_ref[...] = emis                                     # stays in VMEM scratch

    # --------------------------- CRF numerator (gold path) ----------------------------
    trans8 = crf_ref[0:8, :]                                 # (8, 128) from x to
    start = crf_ref[8:9, :]                                  # (1, 128)
    end = crf_ref[9:10, :]                                   # (1, 128)
    y = y_ref[...]                                           # (S, 1) int32 gold tags
    length = lens_ref[row]                                   # scalar int32 from SMEM

    oh = (lax.broadcasted_iota(jnp.int32, (s, tp), 1) == y).astype(jnp.float32)
    oh8 = (lax.broadcasted_iota(jnp.int32, (s, 8), 1) == y).astype(jnp.float32)
    pos = lax.broadcasted_iota(jnp.int32, (s, 1), 0)
    # TODO(synk): mask is assumed to be a contiguous prefix (length-style) mask,
    # matching how the PyTorch module is used; holey masks are not supported.
    maskf = (pos < length).astype(jnp.float32)               # (S, 1)

    e_gold = jnp.sum(oh * emis, axis=1, keepdims=True)                       # (S,1)
    proj = jnp.dot(oh8, trans8, preferred_element_type=jnp.float32)          # (S,128)
    tr_gold = jnp.sum(proj[:s - 1, :] * oh[1:, :], axis=1, keepdims=True)    # (S-1,1)
    ind_last = (pos == length - 1).astype(jnp.float32)
    y_last = jnp.sum(ind_last * oh, axis=0, keepdims=True)                   # (1,128)

    num = (jnp.sum(oh[0:1, :] * start) + jnp.sum(e_gold[0:1, :])
           + jnp.sum((tr_gold + e_gold[1:, :]) * maskf[1:, :])
           + jnp.sum(y_last * end))

    # ----------------- CRF denominator: forward recursion (log partition) -------------
    exp_trans = jnp.exp(trans8)              # hoisted, loop-invariant (phantom rows -> 0)
    alpha_ref[...] = start + emis[0:1, :]    # (1, 128)

    @pl.loop(1, length)                      # padded timesteps are skipped entirely
    def _(t):
        a8 = alpha_ref[:, 0:8]                                           # (1, 8)
        m = jnp.max(a8, axis=1, keepdims=True)                           # (1, 1)
        w8 = jnp.exp(a8 - m)                                             # (1, 8)
        srow = jnp.dot(w8, exp_trans, preferred_element_type=jnp.float32)  # (1,128)
        e_t = emis_ref[pl.ds(t, 1), :]                                   # (1, 128)
        alpha_ref[...] = jnp.log(jnp.maximum(srow, 1e-30)) + m + e_t

    final = alpha_ref[...] + end
    amax = jnp.max(final, axis=1, keepdims=True)
    log_z = jnp.log(jnp.sum(jnp.exp(final - amax), axis=1, keepdims=True)) + amax

    out_ref[...] = (num - log_z).reshape(1, 1, 1)            # per-row log-likelihood

    # TODO(synk): viterbi_decode / back_trace (inference only) use data-dependent
    # Python loops with argmax back-pointers + .item() and are not part of forward().


# ---------------------------------- wrappers ---------------------------------------
def transformer_crf_pallas(h0, y_tags, lengths, p):
    b, s, d = h0.shape
    y3 = y_tags.astype(jnp.int32).reshape(b, s, 1)
    out = pl.pallas_call(
        transformer_crf_kernel,
        out_shape=jax.ShapeDtypeStruct((b, 1, 1), jnp.float32),
        grid_spec=pltpu.PrefetchScalarGridSpec(
            num_scalar_prefetch=1,
            grid=(b,),
            in_specs=[
                pl.BlockSpec((None, s, d), lambda i, lens: (i, 0, 0)),
                pl.BlockSpec((None, s, 1), lambda i, lens: (i, 0, 0)),
                pl.BlockSpec((L, 3 * D + F, TP), lambda i, lens: (0, 0, 0)),
                pl.BlockSpec((L, 8, TP), lambda i, lens: (0, 0, 0)),
                pl.BlockSpec((D, TP), lambda i, lens: (0, 0)),
                pl.BlockSpec((16, TP), lambda i, lens: (0, 0)),
            ],
            out_specs=pl.BlockSpec((1, 1, 1), lambda i, lens: (i, 0, 0)),
            scratch_shapes=[pltpu.VMEM((s, TP), jnp.float32),    # emissions
                            pltpu.VMEM((1, TP), jnp.float32)],   # alpha carry
        ),
        compiler_params=pltpu.CompilerParams(
            dimension_semantics=("parallel",)),
    )(lengths.astype(jnp.int32), h0, y3,
      p['wmat'], p['vecs'], p['tagw'], p['crfp'])
    return out[:, 0, 0]                      # (B,) per-row log-likelihood


def transformer_crf_loss(x_ids, y_tags, mask, p):
    # Embedding lookup + positional encoding stay in plain XLA (no in-kernel vocab
    # one-hot; the gather is O(B*S*D) and keeps the table out of VMEM).
    s = x_ids.shape[1]
    h0 = p['emb'][x_ids] + p['pe'][None, :s, :]
    lengths = jnp.sum(mask.astype(jnp.int32), axis=1)
    ll = transformer_crf_pallas(h0.astype(jnp.float32), y_tags, lengths, p)
    return -jnp.sum(ll) / jnp.sum(mask.astype(jnp.float32))


def pack_params(p):
    """Host-side packing of the raw params into the 4 kernel inputs."""
    wmat = jnp.zeros((L, 3 * D + F, TP), jnp.float32)
    wmat = wmat.at[:, 0:D, 0:3 * D].set(p['wqkv'])
    wmat = wmat.at[:, D:2 * D, 0:D].set(p['wo'])
    wmat = wmat.at[:, 2 * D:3 * D, 0:F].set(p['w1'])
    wmat = wmat.at[:, 3 * D:3 * D + F, 0:D].set(p['w2'])
    p['wmat'] = wmat.astype(jnp.bfloat16)

    vecs = jnp.zeros((L, 8, TP), jnp.float32)
    vecs = vecs.at[:, 0, 0:3 * D].set(p['bqkv'][:, 0, :])
    vecs = vecs.at[:, 1, 0:D].set(p['bo'][:, 0, :])
    vecs = vecs.at[:, 2, 0:D].set(p['ln1g'][:, 0, :])
    vecs = vecs.at[:, 2, D:2 * D].set(p['ln1b'][:, 0, :])
    vecs = vecs.at[:, 2, 2 * D:3 * D].set(p['ln2g'][:, 0, :])
    vecs = vecs.at[:, 2, 3 * D:4 * D].set(p['ln2b'][:, 0, :])
    vecs = vecs.at[:, 3, 0:F].set(p['b1'][:, 0, :])
    vecs = vecs.at[:, 4, 0:D].set(p['b2'][:, 0, :])
    p['vecs'] = vecs

    p['tagw'] = (jnp.zeros((D, TP), jnp.float32)
                 .at[:, :T].set(p['wt']).astype(jnp.bfloat16))

    crfp = jnp.zeros((16, TP), jnp.float32)
    crfp = crfp.at[0:8, :].set(
        jnp.full((8, TP), NEG, jnp.float32).at[:T, :T].set(p['trans']))
    crfp = crfp.at[8, :].set(jnp.full((TP,), NEG, jnp.float32).at[:T].set(p['start']))
    crfp = crfp.at[9, :].set(jnp.full((TP,), NEG, jnp.float32).at[:T].set(p['end']))
    crfp = crfp.at[10, :T].set(p['bt'][0])
    p['crfp'] = crfp
    return p


# ------------------------------ pure-JAX reference ---------------------------------
def encoder_reference(h0, p):
    b, s, d = h0.shape
    hd = d // H
    scale = 1.0 / math.sqrt(hd)
    x = h0.reshape(b * s, d)
    for l in range(L):
        qkv = x @ p['wqkv'][l] + p['bqkv'][l]
        wo = p['wo'][l]
        attn = jnp.zeros((b * s, d), jnp.float32)
        for hh in range(H):
            qh = qkv[:, hh * hd:(hh + 1) * hd].reshape(b, s, hd)
            kh = qkv[:, d + hh * hd:d + (hh + 1) * hd].reshape(b, s, hd)
            vh = qkv[:, 2 * d + hh * hd:2 * d + (hh + 1) * hd].reshape(b, s, hd)
            sc = jnp.einsum('bqe,bke->bqk', qh, kh) * scale
            pr = jax.nn.softmax(sc, axis=-1)
            ho = jnp.einsum('bqk,bke->bqe', pr, vh)
            attn = attn + ho.reshape(b * s, hd) @ wo[hh * hd:(hh + 1) * hd, :]
        attn = attn + p['bo'][l]
        x = _layer_norm(x + attn, p['ln1g'][l], p['ln1b'][l])
        ff = _gelu(x @ p['w1'][l] + p['b1'][l])
        ff = ff @ p['w2'][l] + p['b2'][l]
        x = _layer_norm(x + ff, p['ln2g'][l], p['ln2b'][l])
    feats = x @ p['wt'] + p['bt']
    return feats.reshape(b, s, -1)


def reference_loss(x_ids, y, mask, p):
    """Pure-JAX mirror of TransformerCRF.forward (unpadded tag dimension)."""
    s = x_ids.shape[1]
    h0 = p['emb'][x_ids] + p['pe'][None, :s, :]
    feats = encoder_reference(h0, p)
    trans, start, end = p['trans'], p['start'], p['end']
    maskf = mask.astype(jnp.float32)
    b = feats.shape[0]
    rg = jnp.arange(b)
    score = start[y[:, 0]] + feats[rg, 0, y[:, 0]]
    for t in range(1, s):
        score = score + (trans[y[:, t - 1], y[:, t]] + feats[rg, t, y[:, t]]) * maskf[:, t]
    each_len = maskf.sum(axis=1).astype(jnp.int32)
    score = score + end[y[rg, each_len - 1]] * maskf[rg, each_len - 1]

    alpha = start[None, :] + feats[:, 0]
    for t in range(1, s):
        sc = alpha[:, :, None] + trans[None, :, :] + feats[:, t][:, None, :]
        lse = jax.scipy.special.logsumexp(sc, axis=1)
        alpha = jnp.where(maskf[:, t][:, None] > 0, lse, alpha)
    log_z = jax.scipy.special.logsumexp(alpha + end[None, :], axis=1)
    return -(score - log_z).sum() / maskf.sum()


if __name__ == "__main__":
    key = jax.random.PRNGKey(0)
    ks = jax.random.split(key, 18)
    w = 0.1   # small deterministic init so activations stay well-conditioned

    emb = jax.random.normal(ks[0], (V, D), jnp.float32) * w
    emb = emb.at[0].set(0.0)                               # nn.Embedding padding_idx=0

    params = dict(
        emb=emb,
        wqkv=jax.random.normal(ks[1], (L, D, 3 * D), jnp.float32) * w,
        bqkv=jax.random.normal(ks[2], (L, 1, 3 * D), jnp.float32) * w,
        wo=jax.random.normal(ks[3], (L, D, D), jnp.float32) * w,
        bo=jax.random.normal(ks[4], (L, 1, D), jnp.float32) * w,
        ln1g=jnp.ones((L, 1, D), jnp.float32),
        ln1b=jnp.zeros((L, 1, D), jnp.float32),
        ln2g=jnp.ones((L, 1, D), jnp.float32),
        ln2b=jnp.zeros((L, 1, D), jnp.float32),
        w1=jax.random.normal(ks[5], (L, D, F), jnp.float32) * w,
        b1=jax.random.normal(ks[6], (L, 1, F), jnp.float32) * w,
        w2=jax.random.normal(ks[7], (L, F, D), jnp.float32) * w,
        b2=jax.random.normal(ks[8], (L, 1, D), jnp.float32) * w,
        wt=jax.random.normal(ks[9], (D, T), jnp.float32) * w,
        bt=jax.random.normal(ks[10], (1, T), jnp.float32) * w,
    )

    # ---- CRF parameters (mirrors CRF.__init__ with pad_idx=0) ----
    trans = jax.random.normal(ks[11], (T, T), jnp.float32)
    start = jax.random.normal(ks[12], (T,), jnp.float32)
    end = jax.random.normal(ks[13], (T,), jnp.float32)
    start = start.at[0].set(NEG)
    end = end.at[0].set(NEG)
    trans = trans.at[0, :].set(NEG)
    trans = trans.at[:, 0].set(NEG)
    trans = trans.at[0, 0].set(0.0)
    params.update(trans=trans, start=start, end=end)

    # sinusoidal positional encoding (PositionalEncoding, dropout=0)
    pos = jnp.arange(S, dtype=jnp.float32)[:, None]
    div = jnp.exp(jnp.arange(0, D, 2, dtype=jnp.float32) * (-math.log(10000.0) / D))
    pe = jnp.zeros((S, D), jnp.float32)
    pe = pe.at[:, 0::2].set(jnp.sin(pos * div))
    pe = pe.at[:, 1::2].set(jnp.cos(pos * div))
    params['pe'] = pe

    params = pack_params(params)

    # ---- deterministic example inputs ----
    lengths = jnp.array([8, 5], dtype=jnp.int32)
    mask = jnp.arange(S)[None, :] < lengths[:, None]                 # (B,S) bool
    x_ids = (jax.random.randint(ks[14], (B, S), 1, V) * mask).astype(jnp.int32)
    y_tags = (jax.random.randint(ks[15], (B, S), 1, T) * mask).astype(jnp.int32)

    loss = transformer_crf_loss(x_ids, y_tags, mask, params)
    loss = jax.block_until_ready(loss)

    with jax.default_matmul_precision("highest"):
        ref = reference_loss(x_ids, y_tags, mask, params)
    ref = jax.block_until_ready(ref)

    assert jnp.isfinite(loss), loss
    assert jnp.abs(loss - ref) < 5e-2, (loss, ref)
    print("KERNEL_OK")
</pallas_src>

<mosaic_0001>
module attributes {stable_mosaic.version = 11 : i64} {
  func.func @transformer_crf_kernel(%arg0: i32, %arg1: memref<2xi32, #tpu.memory_space<smem>>, %arg2: memref<1x8x32xf32, #tpu.memory_space<vmem>>, %arg3: memref<1x8x1xi32, #tpu.memory_space<vmem>>, %arg4: memref<2x224x128xbf16, #tpu.memory_space<vmem>>, %arg5: memref<2x8x128xf32, #tpu.memory_space<vmem>>, %arg6: memref<32x128xbf16, #tpu.memory_space<vmem>>, %arg7: memref<16x128xf32, #tpu.memory_space<vmem>>, %arg8: memref<1x1x1xf32, #tpu.memory_space<vmem>>, %arg9: memref<8x128xf32, #tpu.memory_space<vmem>>, %arg10: memref<1x128xf32, #tpu.memory_space<vmem>>) attributes {dimension_semantics = [#tpu.dimension_semantics<parallel>], iteration_bounds = array<i64: 2>, scalar_prefetch = 1 : i64, scratch_operands = 2 : i64, tpu.core_type = #tpu.core_type<tc>, window_params = [{transform_indices = @transform_0, window_bounds = array<i64: 1, 8, 32>}, {transform_indices = @transform_1, window_bounds = array<i64: 1, 8, 1>}, {pipeline_mode = #tpu.pipeline_mode<synchronous>, transform_indices = @transform_2, window_bounds = array<i64: 2, 224, 128>}, {pipeline_mode = #tpu.pipeline_mode<synchronous>, transform_indices = @transform_3, window_bounds = array<i64: 2, 8, 128>}, {pipeline_mode = #tpu.pipeline_mode<synchronous>, transform_indices = @transform_4, window_bounds = array<i64: 32, 128>}, {pipeline_mode = #tpu.pipeline_mode<synchronous>, transform_indices = @transform_5, window_bounds = array<i64: 16, 128>}, {transform_indices = @transform_6, window_bounds = array<i64: 1, 1, 1>}]} {
    %c0 = arith.constant 0 : index
    %c0_0 = arith.constant 0 : index
    %c0_1 = arith.constant 0 : index
    %0 = vector.load %arg2[%c0, %c0_0, %c0_1] : memref<1x8x32xf32, #tpu.memory_space<vmem>>, vector<1x8x32xf32>
    %1 = vector.shape_cast %0 : vector<1x8x32xf32> to vector<8x32xf32>
    %c0_2 = arith.constant 0 : index
    %c0_3 = arith.constant 0 : index
    %c0_4 = arith.constant 0 : index
    %2 = vector.load %arg4[%c0_2, %c0_3, %c0_4] : memref<2x224x128xbf16, #tpu.memory_space<vmem>>, vector<1x32x128xbf16>
    %3 = vector.shape_cast %2 : vector<1x32x128xbf16> to vector<32x128xbf16>
    %c0_5 = arith.constant 0 : index
    %c32 = arith.constant 32 : index
    %c0_6 = arith.constant 0 : index
    %4 = vector.load %arg4[%c0_5, %c32, %c0_6] : memref<2x224x128xbf16, #tpu.memory_space<vmem>>, vector<1x32x32xbf16>
    %5 = vector.shape_cast %4 : vector<1x32x32xbf16> to vector<32x32xbf16>
    %c0_7 = arith.constant 0 : index
    %c64 = arith.constant 64 : index
    %c0_8 = arith.constant 0 : index
    %6 = vector.load %arg4[%c0_7, %c64, %c0_8] : memref<2x224x128xbf16, #tpu.memory_space<vmem>>, vector<1x32x128xbf16>
    %7 = vector.shape_cast %6 : vector<1x32x128xbf16> to vector<32x128xbf16>
    %c0_9 = arith.constant 0 : index
    %c96 = arith.constant 96 : index
    %c0_10 = arith.constant 0 : index
    %8 = vector.load %arg4[%c0_9, %c96, %c0_10] : memref<2x224x128xbf16, #tpu.memory_space<vmem>>, vector<1x128x32xbf16>
    %9 = vector.shape_cast %8 : vector<1x128x32xbf16> to vector<128x32xbf16>
    %c0_11 = arith.constant 0 : index
    %c0_12 = arith.constant 0 : index
    %c0_13 = arith.constant 0 : index
    %10 = vector.load %arg5[%c0_11, %c0_12, %c0_13] : memref<2x8x128xf32, #tpu.memory_space<vmem>>, vector<1x1x128xf32>
    %11 = vector.shape_cast %10 : vector<1x1x128xf32> to vector<1x128xf32>
    %c0_14 = arith.constant 0 : index
    %c1 = arith.constant 1 : index
    %c0_15 = arith.constant 0 : index
    %12 = vector.load %arg5[%c0_14, %c1, %c0_15] : memref<2x8x128xf32, #tpu.memory_space<vmem>>, vector<1x1x32xf32>
    %13 = vector.shape_cast %12 : vector<1x1x32xf32> to vector<1x32xf32>
    %c0_16 = arith.constant 0 : index
    %c2 = arith.constant 2 : index
    %c0_17 = arith.constant 0 : index
    %14 = vector.load %arg5[%c0_16, %c2, %c0_17] : memref<2x8x128xf32, #tpu.memory_space<vmem>>, vector<1x1x32xf32>
    %15 = vector.shape_cast %14 : vector<1x1x32xf32> to vector<1x32xf32>
    %c0_18 = arith.constant 0 : index
    %c2_19 = arith.constant 2 : index
    %c32_20 = arith.constant 32 : index
    %16 = vector.load %arg5[%c0_18, %c2_19, %c32_20] : memref<2x8x128xf32, #tpu.memory_space<vmem>>, vector<1x1x32xf32>
    %17 = vector.shape_cast %16 : vector<1x1x32xf32> to vector<1x32xf32>
    %c0_21 = arith.constant 0 : index
    %c2_22 = arith.constant 2 : index
    %c64_23 = arith.constant 64 : index
    %18 = vector.load %arg5[%c0_21, %c2_22, %c64_23] : memref<2x8x128xf32, #tpu.memory_space<vmem>>, vector<1x1x32xf32>
    %19 = vector.shape_cast %18 : vector<1x1x32xf32> to vector<1x32xf32>
    %c0_24 = arith.constant 0 : index
    %c2_25 = arith.constant 2 : index
    %c96_26 = arith.constant 96 : index
    %20 = vector.load %arg5[%c0_24, %c2_25, %c96_26] : memref<2x8x128xf32, #tpu.memory_space<vmem>>, vector<1x1x32xf32>
    %21 = vector.shape_cast %20 : vector<1x1x32xf32> to vector<1x32xf32>
    %c0_27 = arith.constant 0 : index
    %c3 = arith.constant 3 : index
    %c0_28 = arith.constant 0 : index
    %22 = vector.load %arg5[%c0_27, %c3, %c0_28] : memref<2x8x128xf32, #tpu.memory_space<vmem>>, vector<1x1x128xf32>
    %23 = vector.shape_cast %22 : vector<1x1x128xf32> to vector<1x128xf32>
    %c0_29 = arith.constant 0 : index
    %c4 = arith.constant 4 : index
    %c0_30 = arith.constant 0 : index
    %24 = vector.load %arg5[%c0_29, %c4, %c0_30] : memref<2x8x128xf32, #tpu.memory_space<vmem>>, vector<1x1x32xf32>
    %25 = vector.shape_cast %24 : vector<1x1x32xf32> to vector<1x32xf32>
    %26 = arith.truncf %1 : vector<8x32xf32> to vector<8x32xbf16>
    %cst = arith.constant dense<0.000000e+00> : vector<8x128xf32>
    %27 = tpu.matmul %26, %3, %cst {dimension_numbers = #tpu.dot_dimension_numbers<[1], [0], [0], [1], [0, 0, 1, 1], [], []>} : vector<8x32xbf16>, vector<32x128xbf16>, vector<8x128xf32> -> vector<8x128xf32>
    %28 = vector.broadcast %11 : vector<1x128xf32> to vector<8x128xf32>
    %29 = arith.addf %27, %28 : vector<8x128xf32>
    %30 = vector.extract_strided_slice %29 {offsets = [0, 0], sizes = [8, 8], strides = [1, 1]} : vector<8x128xf32> to vector<8x8xf32>
    %31 = vector.extract_strided_slice %29 {offsets = [0, 32], sizes = [8, 8], strides = [1, 1]} : vector<8x128xf32> to vector<8x8xf32>
    %32 = vector.extract_strided_slice %29 {offsets = [0, 64], sizes = [8, 8], strides = [1, 1]} : vector<8x128xf32> to vector<8x8xf32>
    "tpu.trace_start"() <{level = 10 : i32, message = "qe,ke->qk"}> : () -> ()
    %cst_31 = arith.constant dense<0.000000e+00> : vector<8x8xf32>
    %33 = tpu.matmul %30, %31, %cst_31 {dimension_numbers = #tpu.dot_dimension_numbers<[1], [1], [0], [0], [0, 0, 1, 0], [], []>} : vector<8x8xf32>, vector<8x8xf32>, vector<8x8xf32> -> vector<8x8xf32>
    "tpu.trace_stop"() : () -> ()
    %cst_32 = arith.constant 0.353553385 : f32
    %34 = vector.broadcast %cst_32 : f32 to vector<8x8xf32>
    %35 = arith.mulf %33, %34 : vector<8x8xf32>
    %cst_33 = arith.constant dense<0xFF800000> : vector<8xf32>
    %36 = vector.multi_reduction <maximumf>, %35, %cst_33 [1] : vector<8x8xf32> to vector<8xf32>
    %37 = vector.shape_cast %36 : vector<8xf32> to vector<8x1xf32>
    %38 = vector.broadcast %37 : vector<8x1xf32> to vector<8x8xf32>
    %39 = arith.subf %35, %38 : vector<8x8xf32>
    %40 = math.exp %39 : vector<8x8xf32>
    %cst_34 = arith.constant dense<0.000000e+00> : vector<8xf32>
    %41 = vector.multi_reduction <add>, %40, %cst_34 [1] : vector<8x8xf32> to vector<8xf32>
    %42 = vector.shape_cast %41 : vector<8xf32> to vector<8x1xf32>
    %43 = tpu.reciprocal %42 {approx = true} : vector<8x1xf32> -> vector<8x1xf32>
    %44 = vector.broadcast %43 : vector<8x1xf32> to vector<8x8xf32>
    %45 = arith.mulf %40, %44 : vector<8x8xf32>
    %cst_35 = arith.constant dense<0.000000e+00> : vector<8x8xf32>
    %46 = tpu.matmul %45, %32, %cst_35 {dimension_numbers = #tpu.dot_dimension_numbers<[1], [0], [0], [1], [0, 0, 1, 1], [], []>} : vector<8x8xf32>, vector<8x8xf32>, vector<8x8xf32> -> vector<8x8xf32>
    %47 = vector.extract_strided_slice %29 {offsets = [0, 8], sizes = [8, 8], strides = [1, 1]} : vector<8x128xf32> to vector<8x8xf32>
    %48 = vector.extract_strided_slice %29 {offsets = [0, 40], sizes = [8, 8], strides = [1, 1]} : vector<8x128xf32> to vector<8x8xf32>
    %49 = vector.extract_strided_slice %29 {offsets = [0, 72], sizes = [8, 8], strides = [1, 1]} : vector<8x128xf32> to vector<8x8xf32>
    "tpu.trace_start"() <{level = 10 : i32, message = "qe,ke->qk"}> : () -> ()
    %cst_36 = arith.constant dense<0.000000e+00> : vector<8x8xf32>
    %50 = tpu.matmul %47, %48, %cst_36 {dimension_numbers = #tpu.dot_dimension_numbers<[1], [1], [0], [0], [0, 0, 1, 0], [], []>} : vector<8x8xf32>, vector<8x8xf32>, vector<8x8xf32> -> vector<8x8xf32>
    "tpu.trace_stop"() : () -> ()
    %cst_37 = arith.constant 0.353553385 : f32
    %51 = vector.broadcast %cst_37 : f32 to vector<8x8xf32>
    %52 = arith.mulf %50, %51 : vector<8x8xf32>
    %cst_38 = arith.constant dense<0xFF800000> : vector<8xf32>
    %53 = vector.multi_reduction <maximumf>, %52, %cst_38 [1] : vector<8x8xf32> to vector<8xf32>
    %54 = vector.shape_cast %53 : vector<8xf32> to vector<8x1xf32>
    %55 = vector.broadcast %54 : vector<8x1xf32> to vector<8x8xf32>
    %56 = arith.subf %52, %55 : vector<8x8xf32>
    %57 = math.exp %56 : vector<8x8xf32>
    %cst_39 = arith.constant dense<0.000000e+00> : vector<8xf32>
    %58 = vector.multi_reduction <add>, %57, %cst_39 [1] : vector<8x8xf32> to vector<8xf32>
    %59 = vector.shape_cast %58 : vector<8xf32> to vector<8x1xf32>
    %60 = tpu.reciprocal %59 {approx = true} : vector<8x1xf32> -> vector<8x1xf32>
    %61 = vector.broadcast %60 : vector<8x1xf32> to vector<8x8xf32>
    %62 = arith.mulf %57, %61 : vector<8x8xf32>
    %cst_40 = arith.constant dense<0.000000e+00> : vector<8x8xf32>
    %63 = tpu.matmul %62, %49, %cst_40 {dimension_numbers = #tpu.dot_dimension_numbers<[1], [0], [0], [1], [0, 0, 1, 1], [], []>} : vector<8x8xf32>, vector<8x8xf32>, vector<8x8xf32> -> vector<8x8xf32>
    %64 = vector.extract_strided_slice %29 {offsets = [0, 16], sizes = [8, 8], strides = [1, 1]} : vector<8x128xf32> to vector<8x8xf32>
    %65 = vector.extract_strided_slice %29 {offsets = [0, 48], sizes = [8, 8], strides = [1, 1]} : vector<8x128xf32> to vector<8x8xf32>
    %66 = vector.extract_strided_slice %29 {offsets = [0, 80], sizes = [8, 8], strides = [1, 1]} : vector<8x128xf32> to vector<8x8xf32>
    "tpu.trace_start"() <{level = 10 : i32, message = "qe,ke->qk"}> : () -> ()
    %cst_41 = arith.constant dense<0.000000e+00> : vector<8x8xf32>
    %67 = tpu.matmul %64, %65, %cst_41 {dimension_numbers = #tpu.dot_dimension_numbers<[1], [1], [0], [0], [0, 0, 1, 0], [], []>} : vector<8x8xf32>, vector<8x8xf32>, vector<8x8xf32> -> vector<8x8xf32>
    "tpu.trace_stop"() : () -> ()
    %cst_42 = arith.constant 0.353553385 : f32
    %68 = vector.broadcast %cst_42 : f32 to vector<8x8xf32>
    %69 = arith.mulf %67, %68 : vector<8x8xf32>
    %cst_43 = arith.constant dense<0xFF800000> : vector<8xf32>
    %70 = vector.multi_reduction <maximumf>, %69, %cst_43 [1] : vector<8x8xf32> to vector<8xf32>
    %71 = vector.shape_cast %70 : vector<8xf32> to vector<8x1xf32>
    %72 = vector.broadcast %71 : vector<8x1xf32> to vector<8x8xf32>
    %73 = arith.subf %69, %72 : vector<8x8xf32>
    %74 = math.exp %73 : vector<8x8xf32>
    %cst_44 = arith.constant dense<0.000000e+00> : vector<8xf32>
    %75 = vector.multi_reduction <add>, %74, %cst_44 [1] : vector<8x8xf32> to vector<8xf32>
    %76 = vector.shape_cast %75 : vector<8xf32> to vector<8x1xf32>
    %77 = tpu.reciprocal %76 {approx = true} : vector<8x1xf32> -> vector<8x1xf32>
    %78 = vector.broadcast %77 : vector<8x1xf32> to vector<8x8xf32>
    %79 = arith.mulf %74, %78 : vector<8x8xf32>
    %cst_45 = arith.constant dense<0.000000e+00> : vector<8x8xf32>
    %80 = tpu.matmul %79, %66, %cst_45 {dimension_numbers = #tpu.dot_dimension_numbers<[1], [0], [0], [1], [0, 0, 1, 1], [], []>} : vector<8x8xf32>, vector<8x8xf32>, vector<8x8xf32> -> vector<8x8xf32>
    %81 = vector.extract_strided_slice %29 {offsets = [0, 24], sizes = [8, 8], strides = [1, 1]} : vector<8x128xf32> to vector<8x8xf32>
    %82 = vector.extract_strided_slice %29 {offsets = [0, 56], sizes = [8, 8], strides = [1, 1]} : vector<8x128xf32> to vector<8x8xf32>
    %83 = vector.extract_strided_slice %29 {offsets = [0, 88], sizes = [8, 8], strides = [1, 1]} : vector<8x128xf32> to vector<8x8xf32>
    "tpu.trace_start"() <{level = 10 : i32, message = "qe,ke->qk"}> : () -> ()
    %cst_46 = arith.constant dense<0.000000e+00> : vector<8x8xf32>
    %84 = tpu.matmul %81, %82, %cst_46 {dimension_numbers = #tpu.dot_dimension_numbers<[1], [1], [0], [0], [0, 0, 1, 0], [], []>} : vector<8x8xf32>, vector<8x8xf32>, vector<8x8xf32> -> vector<8x8xf32>
    "tpu.trace_stop"() : () -> ()
    %cst_47 = arith.constant 0.353553385 : f32
    %85 = vector.broadcast %cst_47 : f32 to vector<8x8xf32>
    %86 = arith.mulf %84, %85 : vector<8x8xf32>
    %cst_48 = arith.constant dense<0xFF800000> : vector<8xf32>
    %87 = vector.multi_reduction <maximumf>, %86, %cst_48 [1] : vector<8x8xf32> to vector<8xf32>
    %88 = vector.shape_cast %87 : vector<8xf32> to vector<8x1xf32>
    %89 = vector.broadcast %88 : vector<8x1xf32> to vector<8x8xf32>
    %90 = arith.subf %86, %89 : vector<8x8xf32>
    %91 = math.exp %90 : vector<8x8xf32>
    %cst_49 = arith.constant dense<0.000000e+00> : vector<8xf32>
    %92 = vector.multi_reduction <add>, %91, %cst_49 [1] : vector<8x8xf32> to vector<8xf32>
    %93 = vector.shape_cast %92 : vector<8xf32> to vector<8x1xf32>
    %94 = tpu.reciprocal %93 {approx = true} : vector<8x1xf32> -> vector<8x1xf32>
    %95 = vector.broadcast %94 : vector<8x1xf32> to vector<8x8xf32>
    %96 = arith.mulf %91, %95 : vector<8x8xf32>
    %cst_50 = arith.constant dense<0.000000e+00> : vector<8x8xf32>
    %97 = tpu.matmul %96, %83, %cst_50 {dimension_numbers = #tpu.dot_dimension_numbers<[1], [0], [0], [1], [0, 0, 1, 1], [], []>} : vector<8x8xf32>, vector<8x8xf32>, vector<8x8xf32> -> vector<8x8xf32>
    %98 = tpu.concatenate %46, %63, %80, %97 in 1 : vector<8x8xf32>, vector<8x8xf32>, vector<8x8xf32>, vector<8x8xf32> -> vector<8x32xf32>
    %99 = arith.truncf %98 : vector<8x32xf32> to vector<8x32xbf16>
    %cst_51 = arith.constant dense<0.000000e+00> : vector<8x32xf32>
    %100 = tpu.matmul %99, %5, %cst_51 {dimension_numbers = #tpu.dot_dimension_numbers<[1], [0], [0], [1], [0, 0, 1, 1], [], []>} : vector<8x32xbf16>, vector<32x32xbf16>, vector<8x32xf32> -> vector<8x32xf32>
    %101 = vector.broadcast %13 : vector<1x32xf32> to vector<8x32xf32>
    %102 = arith.addf %100, %101 : vector<8x32xf32>
    %103 = arith.addf %1, %102 : vector<8x32xf32>
    %cst_52 = arith.constant dense<0.000000e+00> : vector<8xf32>
    %104 = vector.multi_reduction <add>, %103, %cst_52 [1] : vector<8x32xf32> to vector<8xf32>
    %105 = vector.shape_cast %104 : vector<8xf32> to vector<8x1xf32>
    %cst_53 = arith.constant 3.200000e+01 : f32
    %106 = vector.broadcast %cst_53 : f32 to vector<8x1xf32>
    %107 = arith.divf %105, %106 : vector<8x1xf32>
    %108 = vector.broadcast %107 : vector<8x1xf32> to vector<8x32xf32>
    %109 = arith.subf %103, %108 : vector<8x32xf32>
    %110 = vector.broadcast %107 : vector<8x1xf32> to vector<8x32xf32>
    %111 = arith.subf %103, %110 : vector<8x32xf32>
    %112 = arith.mulf %109, %111 : vector<8x32xf32>
    %cst_54 = arith.constant dense<0.000000e+00> : vector<8xf32>
    %113 = vector.multi_reduction <add>, %112, %cst_54 [1] : vector<8x32xf32> to vector<8xf32>
    %114 = vector.shape_cast %113 : vector<8xf32> to vector<8x1xf32>
    %cst_55 = arith.constant 3.200000e+01 : f32
    %115 = vector.broadcast %cst_55 : f32 to vector<8x1xf32>
    %116 = arith.divf %114, %115 : vector<8x1xf32>
    %117 = vector.broadcast %107 : vector<8x1xf32> to vector<8x32xf32>
    %118 = arith.subf %103, %117 : vector<8x32xf32>
    %cst_56 = arith.constant 9.99999974E-6 : f32
    %119 = vector.broadcast %cst_56 : f32 to vector<8x1xf32>
    %120 = arith.addf %116, %119 : vector<8x1xf32>
    %121 = math.rsqrt %120 : vector<8x1xf32>
    %122 = vector.broadcast %121 : vector<8x1xf32> to vector<8x32xf32>
    %123 = arith.mulf %118, %122 : vector<8x32xf32>
    %124 = vector.broadcast %15 : vector<1x32xf32> to vector<8x32xf32>
    %125 = arith.mulf %123, %124 : vector<8x32xf32>
    %126 = vector.broadcast %17 : vector<1x32xf32> to vector<8x32xf32>
    %127 = arith.addf %125, %126 : vector<8x32xf32>
    %128 = arith.truncf %127 : vector<8x32xf32> to vector<8x32xbf16>
    %cst_57 = arith.constant dense<0.000000e+00> : vector<8x128xf32>
    %129 = tpu.matmul %128, %7, %cst_57 {dimension_numbers = #tpu.dot_dimension_numbers<[1], [0], [0], [1], [0, 0, 1, 1], [], []>} : vector<8x32xbf16>, vector<32x128xbf16>, vector<8x128xf32> -> vector<8x128xf32>
    %130 = vector.broadcast %23 : vector<1x128xf32> to vector<8x128xf32>
    %131 = arith.addf %129, %130 : vector<8x128xf32>
    %cst_58 = arith.constant 5.000000e-01 : f32
    %132 = vector.broadcast %cst_58 : f32 to vector<8x128xf32>
    %133 = arith.mulf %132, %131 : vector<8x128xf32>
    %cst_59 = arith.constant 4.471500e-02 : f32
    %134 = vector.broadcast %cst_59 : f32 to vector<8x128xf32>
    %135 = arith.mulf %134, %131 : vector<8x128xf32>
    %136 = arith.mulf %135, %131 : vector<8x128xf32>
    %137 = arith.mulf %136, %131 : vector<8x128xf32>
    %138 = arith.addf %131, %137 : vector<8x128xf32>
    %cst_60 = arith.constant 0.797884583 : f32
    %139 = vector.broadcast %cst_60 : f32 to vector<8x128xf32>
    %140 = arith.mulf %139, %138 : vector<8x128xf32>
    %141 = math.tanh %140 : vector<8x128xf32>
    %cst_61 = arith.constant 1.000000e+00 : f32
    %142 = vector.broadcast %cst_61 : f32 to vector<8x128xf32>
    %143 = arith.addf %142, %141 : vector<8x128xf32>
    %144 = arith.mulf %133, %143 : vector<8x128xf32>
    %145 = arith.truncf %144 : vector<8x128xf32> to vector<8x128xbf16>
    %cst_62 = arith.constant dense<0.000000e+00> : vector<8x32xf32>
    %146 = tpu.matmul %145, %9, %cst_62 {dimension_numbers = #tpu.dot_dimension_numbers<[1], [0], [0], [1], [0, 0, 1, 1], [], []>} : vector<8x128xbf16>, vector<128x32xbf16>, vector<8x32xf32> -> vector<8x32xf32>
    %147 = vector.broadcast %25 : vector<1x32xf32> to vector<8x32xf32>
    %148 = arith.addf %146, %147 : vector<8x32xf32>
    %149 = arith.addf %127, %148 : vector<8x32xf32>
    %cst_63 = arith.constant dense<0.000000e+00> : vector<8xf32>
    %150 = vector.multi_reduction <add>, %149, %cst_63 [1] : vector<8x32xf32> to vector<8xf32>
    %151 = vector.shape_cast %150 : vector<8xf32> to vector<8x1xf32>
    %cst_64 = arith.constant 3.200000e+01 : f32
    %152 = vector.broadcast %cst_64 : f32 to vector<8x1xf32>
    %153 = arith.divf %151, %152 : vector<8x1xf32>
    %154 = vector.broadcast %153 : vector<8x1xf32> to vector<8x32xf32>
    %155 = arith.subf %149, %154 : vector<8x32xf32>
    %156 = vector.broadcast %153 : vector<8x1xf32> to vector<8x32xf32>
    %157 = arith.subf %149, %156 : vector<8x32xf32>
    %158 = arith.mulf %155, %157 : vector<8x32xf32>
    %cst_65 = arith.constant dense<0.000000e+00> : vector<8xf32>
    %159 = vector.multi_reduction <add>, %158, %cst_65 [1] : vector<8x32xf32> to vector<8xf32>
    %160 = vector.shape_cast %159 : vector<8xf32> to vector<8x1xf32>
    %cst_66 = arith.constant 3.200000e+01 : f32
    %161 = vector.broadcast %cst_66 : f32 to vector<8x1xf32>
    %162 = arith.divf %160, %161 : vector<8x1xf32>
    %163 = vector.broadcast %153 : vector<8x1xf32> to vector<8x32xf32>
    %164 = arith.subf %149, %163 : vector<8x32xf32>
    %cst_67 = arith.constant 9.99999974E-6 : f32
    %165 = vector.broadcast %cst_67 : f32 to vector<8x1xf32>
    %166 = arith.addf %162, %165 : vector<8x1xf32>
    %167 = math.rsqrt %166 : vector<8x1xf32>
    %168 = vector.broadcast %167 : vector<8x1xf32> to vector<8x32xf32>
    %169 = arith.mulf %164, %168 : vector<8x32xf32>
    %170 = vector.broadcast %19 : vector<1x32xf32> to vector<8x32xf32>
    %171 = arith.mulf %169, %170 : vector<8x32xf32>
    %172 = vector.broadcast %21 : vector<1x32xf32> to vector<8x32xf32>
    %173 = arith.addf %171, %172 : vector<8x32xf32>
    %c1_68 = arith.constant 1 : index
    %c0_69 = arith.constant 0 : index
    %c0_70 = arith.constant 0 : index
    %174 = vector.load %arg4[%c1_68, %c0_69, %c0_70] : memref<2x224x128xbf16, #tpu.memory_space<vmem>>, vector<1x32x128xbf16>
    %175 = vector.shape_cast %174 : vector<1x32x128xbf16> to vector<32x128xbf16>
    %c1_71 = arith.constant 1 : index
    %c32_72 = arith.constant 32 : index
    %c0_73 = arith.constant 0 : index
    %176 = vector.load %arg4[%c1_71, %c32_72, %c0_73] : memref<2x224x128xbf16, #tpu.memory_space<vmem>>, vector<1x32x32xbf16>
    %177 = vector.shape_cast %176 : vector<1x32x32xbf16> to vector<32x32xbf16>
    %c1_74 = arith.constant 1 : index
    %c64_75 = arith.constant 64 : index
    %c0_76 = arith.constant 0 : index
    %178 = vector.load %arg4[%c1_74, %c64_75, %c0_76] : memref<2x224x128xbf16, #tpu.memory_space<vmem>>, vector<1x32x128xbf16>
    %179 = vector.shape_cast %178 : vector<1x32x128xbf16> to vector<32x128xbf16>
    %c1_77 = arith.constant 1 : index
    %c96_78 = arith.constant 96 : index
    %c0_79 = arith.constant 0 : index
    %180 = vector.load %arg4[%c1_77, %c96_78, %c0_79] : memref<2x224x128xbf16, #tpu.memory_space<vmem>>, vector<1x128x32xbf16>
    %181 = vector.shape_cast %180 : vector<1x128x32xbf16> to vector<128x32xbf16>
    %c1_80 = arith.constant 1 : index
    %c0_81 = arith.constant 0 : index
    %c0_82 = arith.constant 0 : index
    %182 = vector.load %arg5[%c1_80, %c0_81, %c0_82] : memref<2x8x128xf32, #tpu.memory_space<vmem>>, vector<1x1x128xf32>
    %183 = vector.shape_cast %182 : vector<1x1x128xf32> to vector<1x128xf32>
    %c1_83 = arith.constant 1 : index
    %c1_84 = arith.constant 1 : index
    %c0_85 = arith.constant 0 : index
    %184 = vector.load %arg5[%c1_83, %c1_84, %c0_85] : memref<2x8x128xf32, #tpu.memory_space<vmem>>, vector<1x1x32xf32>
    %185 = vector.shape_cast %184 : vector<1x1x32xf32> to vector<1x32xf32>
    %c1_86 = arith.constant 1 : index
    %c2_87 = arith.constant 2 : index
    %c0_88 = arith.constant 0 : index
    %186 = vector.load %arg5[%c1_86, %c2_87, %c0_88] : memref<2x8x128xf32, #tpu.memory_space<vmem>>, vector<1x1x32xf32>
    %187 = vector.shape_cast %186 : vector<1x1x32xf32> to vector<1x32xf32>
    %c1_89 = arith.constant 1 : index
    %c2_90 = arith.constant 2 : index
    %c32_91 = arith.constant 32 : index
    %188 = vector.load %arg5[%c1_89, %c2_90, %c32_91] : memref<2x8x128xf32, #tpu.memory_space<vmem>>, vector<1x1x32xf32>
    %189 = vector.shape_cast %188 : vector<1x1x32xf32> to vector<1x32xf32>
    %c1_92 = arith.constant 1 : index
    %c2_93 = arith.constant 2 : index
    %c64_94 = arith.constant 64 : index
    %190 = vector.load %arg5[%c1_92, %c2_93, %c64_94] : memref<2x8x128xf32, #tpu.memory_space<vmem>>, vector<1x1x32xf32>
    %191 = vector.shape_cast %190 : vector<1x1x32xf32> to vector<1x32xf32>
    %c1_95 = arith.constant 1 : index
    %c2_96 = arith.constant 2 : index
    %c96_97 = arith.constant 96 : index
    %192 = vector.load %arg5[%c1_95, %c2_96, %c96_97] : memref<2x8x128xf32, #tpu.memory_space<vmem>>, vector<1x1x32xf32>
    %193 = vector.shape_cast %192 : vector<1x1x32xf32> to vector<1x32xf32>
    %c1_98 = arith.constant 1 : index
    %c3_99 = arith.constant 3 : index
    %c0_100 = arith.constant 0 : index
    %194 = vector.load %arg5[%c1_98, %c3_99, %c0_100] : memref<2x8x128xf32, #tpu.memory_space<vmem>>, vector<1x1x128xf32>
    %195 = vector.shape_cast %194 : vector<1x1x128xf32> to vector<1x128xf32>
    %c1_101 = arith.constant 1 : index
    %c4_102 = arith.constant 4 : index
    %c0_103 = arith.constant 0 : index
    %196 = vector.load %arg5[%c1_101, %c4_102, %c0_103] : memref<2x8x128xf32, #tpu.memory_space<vmem>>, vector<1x1x32xf32>
    %197 = vector.shape_cast %196 : vector<1x1x32xf32> to vector<1x32xf32>
    %198 = arith.truncf %173 : vector<8x32xf32> to vector<8x32xbf16>
    %cst_104 = arith.constant dense<0.000000e+00> : vector<8x128xf32>
    %199 = tpu.matmul %198, %175, %cst_104 {dimension_numbers = #tpu.dot_dimension_numbers<[1], [0], [0], [1], [0, 0, 1, 1], [], []>} : vector<8x32xbf16>, vector<32x128xbf16>, vector<8x128xf32> -> vector<8x128xf32>
    %200 = vector.broadcast %183 : vector<1x128xf32> to vector<8x128xf32>
    %201 = arith.addf %199, %200 : vector<8x128xf32>
    %202 = vector.extract_strided_slice %201 {offsets = [0, 0], sizes = [8, 8], strides = [1, 1]} : vector<8x128xf32> to vector<8x8xf32>
    %203 = vector.extract_strided_slice %201 {offsets = [0, 32], sizes = [8, 8], strides = [1, 1]} : vector<8x128xf32> to vector<8x8xf32>
    %204 = vector.extract_strided_slice %201 {offsets = [0, 64], sizes = [8, 8], strides = [1, 1]} : vector<8x128xf32> to vector<8x8xf32>
    "tpu.trace_start"() <{level = 10 : i32, message = "qe,ke->qk"}> : () -> ()
    %cst_105 = arith.constant dense<0.000000e+00> : vector<8x8xf32>
    %205 = tpu.matmul %202, %203, %cst_105 {dimension_numbers = #tpu.dot_dimension_numbers<[1], [1], [0], [0], [0, 0, 1, 0], [], []>} : vector<8x8xf32>, vector<8x8xf32>, vector<8x8xf32> -> vector<8x8xf32>
    "tpu.trace_stop"() : () -> ()
    %cst_106 = arith.constant 0.353553385 : f32
    %206 = vector.broadcast %cst_106 : f32 to vector<8x8xf32>
    %207 = arith.mulf %205, %206 : vector<8x8xf32>
    %cst_107 = arith.constant dense<0xFF800000> : vector<8xf32>
    %208 = vector.multi_reduction <maximumf>, %207, %cst_107 [1] : vector<8x8xf32> to vector<8xf32>
    %209 = vector.shape_cast %208 : vector<8xf32> to vector<8x1xf32>
    %210 = vector.broadcast %209 : vector<8x1xf32> to vector<8x8xf32>
    %211 = arith.subf %207, %210 : vector<8x8xf32>
    %212 = math.exp %211 : vector<8x8xf32>
    %cst_108 = arith.constant dense<0.000000e+00> : vector<8xf32>
    %213 = vector.multi_reduction <add>, %212, %cst_108 [1] : vector<8x8xf32> to vector<8xf32>
    %214 = vector.shape_cast %213 : vector<8xf32> to vector<8x1xf32>
    %215 = tpu.reciprocal %214 {approx = true} : vector<8x1xf32> -> vector<8x1xf32>
    %216 = vector.broadcast %215 : vector<8x1xf32> to vector<8x8xf32>
    %217 = arith.mulf %212, %216 : vector<8x8xf32>
    %cst_109 = arith.constant dense<0.000000e+00> : vector<8x8xf32>
    %218 = tpu.matmul %217, %204, %cst_109 {dimension_numbers = #tpu.dot_dimension_numbers<[1], [0], [0], [1], [0, 0, 1, 1], [], []>} : vector<8x8xf32>, vector<8x8xf32>, vector<8x8xf32> -> vector<8x8xf32>
    %219 = vector.extract_strided_slice %201 {offsets = [0, 8], sizes = [8, 8], strides = [1, 1]} : vector<8x128xf32> to vector<8x8xf32>
    %220 = vector.extract_strided_slice %201 {offsets = [0, 40], sizes = [8, 8], strides = [1, 1]} : vector<8x128xf32> to vector<8x8xf32>
    %221 = vector.extract_strided_slice %201 {offsets = [0, 72], sizes = [8, 8], strides = [1, 1]} : vector<8x128xf32> to vector<8x8xf32>
    "tpu.trace_start"() <{level = 10 : i32, message = "qe,ke->qk"}> : () -> ()
    %cst_110 = arith.constant dense<0.000000e+00> : vector<8x8xf32>
    %222 = tpu.matmul %219, %220, %cst_110 {dimension_numbers = #tpu.dot_dimension_numbers<[1], [1], [0], [0], [0, 0, 1, 0], [], []>} : vector<8x8xf32>, vector<8x8xf32>, vector<8x8xf32> -> vector<8x8xf32>
    "tpu.trace_stop"() : () -> ()
    %cst_111 = arith.constant 0.353553385 : f32
    %223 = vector.broadcast %cst_111 : f32 to vector<8x8xf32>
    %224 = arith.mulf %222, %223 : vector<8x8xf32>
    %cst_112 = arith.constant dense<0xFF800000> : vector<8xf32>
    %225 = vector.multi_reduction <maximumf>, %224, %cst_112 [1] : vector<8x8xf32> to vector<8xf32>
    %226 = vector.shape_cast %225 : vector<8xf32> to vector<8x1xf32>
    %227 = vector.broadcast %226 : vector<8x1xf32> to vector<8x8xf32>
    %228 = arith.subf %224, %227 : vector<8x8xf32>
    %229 = math.exp %228 : vector<8x8xf32>
    %cst_113 = arith.constant dense<0.000000e+00> : vector<8xf32>
    %230 = vector.multi_reduction <add>, %229, %cst_113 [1] : vector<8x8xf32> to vector<8xf32>
    %231 = vector.shape_cast %230 : vector<8xf32> to vector<8x1xf32>
    %232 = tpu.reciprocal %231 {approx = true} : vector<8x1xf32> -> vector<8x1xf32>
    %233 = vector.broadcast %232 : vector<8x1xf32> to vector<8x8xf32>
    %234 = arith.mulf %229, %233 : vector<8x8xf32>
    %cst_114 = arith.constant dense<0.000000e+00> : vector<8x8xf32>
    %235 = tpu.matmul %234, %221, %cst_114 {dimension_numbers = #tpu.dot_dimension_numbers<[1], [0], [0], [1], [0, 0, 1, 1], [], []>} : vector<8x8xf32>, vector<8x8xf32>, vector<8x8xf32> -> vector<8x8xf32>
    %236 = vector.extract_strided_slice %201 {offsets = [0, 16], sizes = [8, 8], strides = [1, 1]} : vector<8x128xf32> to vector<8x8xf32>
    %237 = vector.extract_strided_slice %201 {offsets = [0, 48], sizes = [8, 8], strides = [1, 1]} : vector<8x128xf32> to vector<8x8xf32>
    %238 = vector.extract_strided_slice %201 {offsets = [0, 80], sizes = [8, 8], strides = [1, 1]} : vector<8x128xf32> to vector<8x8xf32>
    "tpu.trace_start"() <{level = 10 : i32, message = "qe,ke->qk"}> : () -> ()
    %cst_115 = arith.constant dense<0.000000e+00> : vector<8x8xf32>
    %239 = tpu.matmul %236, %237, %cst_115 {dimension_numbers = #tpu.dot_dimension_numbers<[1], [1], [0], [0], [0, 0, 1, 0], [], []>} : vector<8x8xf32>, vector<8x8xf32>, vector<8x8xf32> -> vector<8x8xf32>
    "tpu.trace_stop"() : () -> ()
    %cst_116 = arith.constant 0.353553385 : f32
    %240 = vector.broadcast %cst_116 : f32 to vector<8x8xf32>
    %241 = arith.mulf %239, %240 : vector<8x8xf32>
    %cst_117 = arith.constant dense<0xFF800000> : vector<8xf32>
    %242 = vector.multi_reduction <maximumf>, %241, %cst_117 [1] : vector<8x8xf32> to vector<8xf32>
    %243 = vector.shape_cast %242 : vector<8xf32> to vector<8x1xf32>
    %244 = vector.broadcast %243 : vector<8x1xf32> to vector<8x8xf32>
    %245 = arith.subf %241, %244 : vector<8x8xf32>
    %246 = math.exp %245 : vector<8x8xf32>
    %cst_118 = arith.constant dense<0.000000e+00> : vector<8xf32>
    %247 = vector.multi_reduction <add>, %246, %cst_118 [1] : vector<8x8xf32> to vector<8xf32>
    %248 = vector.shape_cast %247 : vector<8xf32> to vector<8x1xf32>
    %249 = tpu.reciprocal %248 {approx = true} : vector<8x1xf32> -> vector<8x1xf32>
    %250 = vector.broadcast %249 : vector<8x1xf32> to vector<8x8xf32>
    %251 = arith.mulf %246, %250 : vector<8x8xf32>
    %cst_119 = arith.constant dense<0.000000e+00> : vector<8x8xf32>
    %252 = tpu.matmul %251, %238, %cst_119 {dimension_numbers = #tpu.dot_dimension_numbers<[1], [0], [0], [1], [0, 0, 1, 1], [], []>} : vector<8x8xf32>, vector<8x8xf32>, vector<8x8xf32> -> vector<8x8xf32>
    %253 = vector.extract_strided_slice %201 {offsets = [0, 24], sizes = [8, 8], strides = [1, 1]} : vector<8x128xf32> to vector<8x8xf32>
    %254 = vector.extract_strided_slice %201 {offsets = [0, 56], sizes = [8, 8], strides = [1, 1]} : vector<8x128xf32> to vector<8x8xf32>
    %255 = vector.extract_strided_slice %201 {offsets = [0, 88], sizes = [8, 8], strides = [1, 1]} : vector<8x128xf32> to vector<8x8xf32>
    "tpu.trace_start"() <{level = 10 : i32, message = "qe,ke->qk"}> : () -> ()
    %cst_120 = arith.constant dense<0.000000e+00> : vector<8x8xf32>
    %256 = tpu.matmul %253, %254, %cst_120 {dimension_numbers = #tpu.dot_dimension_numbers<[1], [1], [0], [0], [0, 0, 1, 0], [], []>} : vector<8x8xf32>, vector<8x8xf32>, vector<8x8xf32> -> vector<8x8xf32>
    "tpu.trace_stop"() : () -> ()
    %cst_121 = arith.constant 0.353553385 : f32
    %257 = vector.broadcast %cst_121 : f32 to vector<8x8xf32>
    %258 = arith.mulf %256, %257 : vector<8x8xf32>
    %cst_122 = arith.constant dense<0xFF800000> : vector<8xf32>
    %259 = vector.multi_reduction <maximumf>, %258, %cst_122 [1] : vector<8x8xf32> to vector<8xf32>
    %260 = vector.shape_cast %259 : vector<8xf32> to vector<8x1xf32>
    %261 = vector.broadcast %260 : vector<8x1xf32> to vector<8x8xf32>
    %262 = arith.subf %258, %261 : vector<8x8xf32>
    %263 = math.exp %262 : vector<8x8xf32>
    %cst_123 = arith.constant dense<0.000000e+00> : vector<8xf32>
    %264 = vector.multi_reduction <add>, %263, %cst_123 [1] : vector<8x8xf32> to vector<8xf32>
    %265 = vector.shape_cast %264 : vector<8xf32> to vector<8x1xf32>
    %266 = tpu.reciprocal %265 {approx = true} : vector<8x1xf32> -> vector<8x1xf32>
    %267 = vector.broadcast %266 : vector<8x1xf32> to vector<8x8xf32>
    %268 = arith.mulf %263, %267 : vector<8x8xf32>
    %cst_124 = arith.constant dense<0.000000e+00> : vector<8x8xf32>
    %269 = tpu.matmul %268, %255, %cst_124 {dimension_numbers = #tpu.dot_dimension_numbers<[1], [0], [0], [1], [0, 0, 1, 1], [], []>} : vector<8x8xf32>, vector<8x8xf32>, vector<8x8xf32> -> vector<8x8xf32>
    %270 = tpu.concatenate %218, %235, %252, %269 in 1 : vector<8x8xf32>, vector<8x8xf32>, vector<8x8xf32>, vector<8x8xf32> -> vector<8x32xf32>
    %271 = arith.truncf %270 : vector<8x32xf32> to vector<8x32xbf16>
    %cst_125 = arith.constant dense<0.000000e+00> : vector<8x32xf32>
    %272 = tpu.matmul %271, %177, %cst_125 {dimension_numbers = #tpu.dot_dimension_numbers<[1], [0], [0], [1], [0, 0, 1, 1], [], []>} : vector<8x32xbf16>, vector<32x32xbf16>, vector<8x32xf32> -> vector<8x32xf32>
    %273 = vector.broadcast %185 : vector<1x32xf32> to vector<8x32xf32>
    %274 = arith.addf %272, %273 : vector<8x32xf32>
    %275 = arith.addf %173, %274 : vector<8x32xf32>
    %cst_126 = arith.constant dense<0.000000e+00> : vector<8xf32>
    %276 = vector.multi_reduction <add>, %275, %cst_126 [1] : vector<8x32xf32> to vector<8xf32>
    %277 = vector.shape_cast %276 : vector<8xf32> to vector<8x1xf32>
    %cst_127 = arith.constant 3.200000e+01 : f32
    %278 = vector.broadcast %cst_127 : f32 to vector<8x1xf32>
    %279 = arith.divf %277, %278 : vector<8x1xf32>
    %280 = vector.broadcast %279 : vector<8x1xf32> to vector<8x32xf32>
    %281 = arith.subf %275, %280 : vector<8x32xf32>
    %282 = vector.broadcast %279 : vector<8x1xf32> to vector<8x32xf32>
    %283 = arith.subf %275, %282 : vector<8x32xf32>
    %284 = arith.mulf %281, %283 : vector<8x32xf32>
    %cst_128 = arith.constant dense<0.000000e+00> : vector<8xf32>
    %285 = vector.multi_reduction <add>, %284, %cst_128 [1] : vector<8x32xf32> to vector<8xf32>
    %286 = vector.shape_cast %285 : vector<8xf32> to vector<8x1xf32>
    %cst_129 = arith.constant 3.200000e+01 : f32
    %287 = vector.broadcast %cst_129 : f32 to vector<8x1xf32>
    %288 = arith.divf %286, %287 : vector<8x1xf32>
    %289 = vector.broadcast %279 : vector<8x1xf32> to vector<8x32xf32>
    %290 = arith.subf %275, %289 : vector<8x32xf32>
    %cst_130 = arith.constant 9.99999974E-6 : f32
    %291 = vector.broadcast %cst_130 : f32 to vector<8x1xf32>
    %292 = arith.addf %288, %291 : vector<8x1xf32>
    %293 = math.rsqrt %292 : vector<8x1xf32>
    %294 = vector.broadcast %293 : vector<8x1xf32> to vector<8x32xf32>
    %295 = arith.mulf %290, %294 : vector<8x32xf32>
    %296 = vector.broadcast %187 : vector<1x32xf32> to vector<8x32xf32>
    %297 = arith.mulf %295, %296 : vector<8x32xf32>
    %298 = vector.broadcast %189 : vector<1x32xf32> to vector<8x32xf32>
    %299 = arith.addf %297, %298 : vector<8x32xf32>
    %300 = arith.truncf %299 : vector<8x32xf32> to vector<8x32xbf16>
    %cst_131 = arith.constant dense<0.000000e+00> : vector<8x128xf32>
    %301 = tpu.matmul %300, %179, %cst_131 {dimension_numbers = #tpu.dot_dimension_numbers<[1], [0], [0], [1], [0, 0, 1, 1], [], []>} : vector<8x32xbf16>, vector<32x128xbf16>, vector<8x128xf32> -> vector<8x128xf32>
    %302 = vector.broadcast %195 : vector<1x128xf32> to vector<8x128xf32>
    %303 = arith.addf %301, %302 : vector<8x128xf32>
    %cst_132 = arith.constant 5.000000e-01 : f32
    %304 = vector.broadcast %cst_132 : f32 to vector<8x128xf32>
    %305 = arith.mulf %304, %303 : vector<8x128xf32>
    %cst_133 = arith.constant 4.471500e-02 : f32
    %306 = vector.broadcast %cst_133 : f32 to vector<8x128xf32>
    %307 = arith.mulf %306, %303 : vector<8x128xf32>
    %308 = arith.mulf %307, %303 : vector<8x128xf32>
    %309 = arith.mulf %308, %303 : vector<8x128xf32>
    %310 = arith.addf %303, %309 : vector<8x128xf32>
    %cst_134 = arith.constant 0.797884583 : f32
    %311 = vector.broadcast %cst_134 : f32 to vector<8x128xf32>
    %312 = arith.mulf %311, %310 : vector<8x128xf32>
    %313 = math.tanh %312 : vector<8x128xf32>
    %cst_135 = arith.constant 1.000000e+00 : f32
    %314 = vector.broadcast %cst_135 : f32 to vector<8x128xf32>
    %315 = arith.addf %314, %313 : vector<8x128xf32>
    %316 = arith.mulf %305, %315 : vector<8x128xf32>
    %317 = arith.truncf %316 : vector<8x128xf32> to vector<8x128xbf16>
    %cst_136 = arith.constant dense<0.000000e+00> : vector<8x32xf32>
    %318 = tpu.matmul %317, %181, %cst_136 {dimension_numbers = #tpu.dot_dimension_numbers<[1], [0], [0], [1], [0, 0, 1, 1], [], []>} : vector<8x128xbf16>, vector<128x32xbf16>, vector<8x32xf32> -> vector<8x32xf32>
    %319 = vector.broadcast %197 : vector<1x32xf32> to vector<8x32xf32>
    %320 = arith.addf %318, %319 : vector<8x32xf32>
    %321 = arith.addf %299, %320 : vector<8x32xf32>
    %cst_137 = arith.constant dense<0.000000e+00> : vector<8xf32>
    %322 = vector.multi_reduction <add>, %321, %cst_137 [1] : vector<8x32xf32> to vector<8xf32>
    %323 = vector.shape_cast %322 : vector<8xf32> to vector<8x1xf32>
    %cst_138 = arith.constant 3.200000e+01 : f32
    %324 = vector.broadcast %cst_138 : f32 to vector<8x1xf32>
    %325 = arith.divf %323, %324 : vector<8x1xf32>
    %326 = vector.broadcast %325 : vector<8x1xf32> to vector<8x32xf32>
    %327 = arith.subf %321, %326 : vector<8x32xf32>
    %328 = vector.broadcast %325 : vector<8x1xf32> to vector<8x32xf32>
    %329 = arith.subf %321, %328 : vector<8x32xf32>
    %330 = arith.mulf %327, %329 : vector<8x32xf32>
    %cst_139 = arith.constant dense<0.000000e+00> : vector<8xf32>
    %331 = vector.multi_reduction <add>, %330, %cst_139 [1] : vector<8x32xf32> to vector<8xf32>
    %332 = vector.shape_cast %331 : vector<8xf32> to vector<8x1xf32>
    %cst_140 = arith.constant 3.200000e+01 : f32
    %333 = vector.broadcast %cst_140 : f32 to vector<8x1xf32>
    %334 = arith.divf %332, %333 : vector<8x1xf32>
    %335 = vector.broadcast %325 : vector<8x1xf32> to vector<8x32xf32>
    %336 = arith.subf %321, %335 : vector<8x32xf32>
    %cst_141 = arith.constant 9.99999974E-6 : f32
    %337 = vector.broadcast %cst_141 : f32 to vector<8x1xf32>
    %338 = arith.addf %334, %337 : vector<8x1xf32>
    %339 = math.rsqrt %338 : vector<8x1xf32>
    %340 = vector.broadcast %339 : vector<8x1xf32> to vector<8x32xf32>
    %341 = arith.mulf %336, %340 : vector<8x32xf32>
    %342 = vector.broadcast %191 : vector<1x32xf32> to vector<8x32xf32>
    %343 = arith.mulf %341, %342 : vector<8x32xf32>
    %344 = vector.broadcast %193 : vector<1x32xf32> to vector<8x32xf32>
    %345 = arith.addf %343, %344 : vector<8x32xf32>
    %c10 = arith.constant 10 : index
    %c0_142 = arith.constant 0 : index
    %346 = vector.load %arg7[%c10, %c0_142] : memref<16x128xf32, #tpu.memory_space<vmem>>, vector<1x128xf32>
    %347 = arith.truncf %345 : vector<8x32xf32> to vector<8x32xbf16>
    %c0_143 = arith.constant 0 : index
    %c0_144 = arith.constant 0 : index
    %348 = vector.load %arg6[%c0_143, %c0_144] : memref<32x128xbf16, #tpu.memory_space<vmem>>, vector<32x128xbf16>
    %cst_145 = arith.constant dense<0.000000e+00> : vector<8x128xf32>
    %349 = tpu.matmul %347, %348, %cst_145 {dimension_numbers = #tpu.dot_dimension_numbers<[1], [0], [0], [1], [0, 0, 1, 1], [], []>} : vector<8x32xbf16>, vector<32x128xbf16>, vector<8x128xf32> -> vector<8x128xf32>
    %350 = vector.broadcast %346 : vector<1x128xf32> to vector<8x128xf32>
    %351 = arith.addf %349, %350 : vector<8x128xf32>
    %c0_146 = arith.constant 0 : index
    %c0_147 = arith.constant 0 : index
    %352 = vector.load %arg9[%c0_146, %c0_147] : memref<8x128xf32, #tpu.memory_space<vmem>>, vector<8x128xf32>
    tpu.vector_store %arg9[%c0_146, %c0_147], %351 {strides = array<i32>} : memref<8x128xf32, #tpu.memory_space<vmem>>, vector<8x128xf32>,
    %c0_148 = arith.constant 0 : index
    %c0_149 = arith.constant 0 : index
    %353 = vector.load %arg7[%c0_148, %c0_149] : memref<16x128xf32, #tpu.memory_space<vmem>>, vector<8x128xf32>
    %c8 = arith.constant 8 : index
    %c0_150 = arith.constant 0 : index
    %354 = vector.load %arg7[%c8, %c0_150] : memref<16x128xf32, #tpu.memory_space<vmem>>, vector<1x128xf32>
    %c9 = arith.constant 9 : index
    %c0_151 = arith.constant 0 : index
    %355 = vector.load %arg7[%c9, %c0_151] : memref<16x128xf32, #tpu.memory_space<vmem>>, vector<1x128xf32>
    %c0_152 = arith.constant 0 : index
    %c0_153 = arith.constant 0 : index
    %c0_154 = arith.constant 0 : index
    %356 = vector.load %arg3[%c0_152, %c0_153, %c0_154] : memref<1x8x1xi32, #tpu.memory_space<vmem>>, vector<1x8x1xi32>
    %357 = vector.shape_cast %356 : vector<1x8x1xi32> to vector<8x1xi32>
    %358 = arith.index_cast %arg0 : i32 to index
    %359 = memref.load %arg1[%358] : memref<2xi32, #tpu.memory_space<smem>>
    %360 = tpu.iota {dimensions = array<i32: 1>} : vector<8x128xi32>
    %361 = vector.broadcast %357 : vector<8x1xi32> to vector<8x128xi32>
    %362 = arith.cmpi eq, %360, %361 : vector<8x128xi32>
    %363 = arith.extui %362 : vector<8x128xi1> to vector<8x128xi32>
    %364 = arith.sitofp %363 : vector<8x128xi32> to vector<8x128xf32>
    %365 = tpu.iota {dimensions = array<i32: 1>} : vector<8x8xi32>
    %366 = vector.broadcast %357 : vector<8x1xi32> to vector<8x8xi32>
    %367 = arith.cmpi eq, %365, %366 : vector<8x8xi32>
    %368 = arith.extui %367 : vector<8x8xi1> to vector<8x8xi32>
    %369 = arith.sitofp %368 : vector<8x8xi32> to vector<8x8xf32>
    %370 = tpu.iota {dimensions = array<i32: 0>} : vector<8x1xi32>
    %371 = vector.broadcast %359 : i32 to vector<8x1xi32>
    %372 = arith.cmpi slt, %370, %371 : vector<8x1xi32>
    %373 = arith.extui %372 : vector<8x1xi1> to vector<8x1xi32>
    %374 = arith.sitofp %373 : vector<8x1xi32> to vector<8x1xf32>
    %375 = arith.mulf %364, %351 : vector<8x128xf32>
    %cst_155 = arith.constant dense<0.000000e+00> : vector<8xf32>
    %376 = vector.multi_reduction <add>, %375, %cst_155 [1] : vector<8x128xf32> to vector<8xf32>
    %377 = vector.shape_cast %376 : vector<8xf32> to vector<8x1xf32>
    %cst_156 = arith.constant dense<0.000000e+00> : vector<8x128xf32>
    %378 = tpu.matmul %369, %353, %cst_156 {dimension_numbers = #tpu.dot_dimension_numbers<[1], [0], [0], [1], [0, 0, 1, 1], [], []>} : vector<8x8xf32>, vector<8x128xf32>, vector<8x128xf32> -> vector<8x128xf32>
    %379 = vector.extract_strided_slice %378 {offsets = [0, 0], sizes = [7, 128], strides = [1, 1]} : vector<8x128xf32> to vector<7x128xf32>
    %380 = vector.extract_strided_slice %364 {offsets = [1, 0], sizes = [7, 128], strides = [1, 1]} : vector<8x128xf32> to vector<7x128xf32>
    %381 = arith.mulf %379, %380 : vector<7x128xf32>
    %cst_157 = arith.constant dense<0.000000e+00> : vector<7xf32>
    %382 = vector.multi_reduction <add>, %381, %cst_157 [1] : vector<7x128xf32> to vector<7xf32>
    %383 = vector.shape_cast %382 : vector<7xf32> to vector<7x1xf32>
    %c1_i32 = arith.constant 1 : i32
    %384 = arith.subi %359, %c1_i32 : i32
    %385 = vector.broadcast %384 : i32 to vector<8x1xi32>
    %386 = arith.cmpi eq, %370, %385 : vector<8x1xi32>
    %387 = arith.extui %386 : vector<8x1xi1> to vector<8x1xi32>
    %388 = arith.sitofp %387 : vector<8x1xi32> to vector<8x1xf32>
    %389 = vector.broadcast %388 : vector<8x1xf32> to vector<8x128xf32>
    %390 = arith.mulf %389, %364 : vector<8x128xf32>
    %cst_158 = arith.constant dense<0.000000e+00> : vector<128xf32>
    %391 = vector.multi_reduction <add>, %390, %cst_158 [0] : vector<8x128xf32> to vector<128xf32>
    %392 = vector.shape_cast %391 : vector<128xf32> to vector<1x128xf32>
    %393 = vector.extract_strided_slice %364 {offsets = [0, 0], sizes = [1, 128], strides = [1, 1]} : vector<8x128xf32> to vector<1x128xf32>
    %394 = arith.mulf %393, %354 : vector<1x128xf32>
    %395 = vector.shape_cast %394 : vector<1x128xf32> to vector<1x1x128xf32>
    %cst_159 = arith.constant dense<0.000000e+00> : vector<1xf32>
    %396 = vector.multi_reduction <add>, %395, %cst_159 [1, 2] : vector<1x1x128xf32> to vector<1xf32>
    %397 = vector.shape_cast %396 : vector<1xf32> to vector<1x1x1xf32>
    %398 = vector.extract %397[0, 0, 0] : f32 from vector<1x1x1xf32>
    %399 = vector.extract_strided_slice %377 {offsets = [0, 0], sizes = [1, 1], strides = [1, 1]} : vector<8x1xf32> to vector<1x1xf32>
    %400 = vector.shape_cast %399 : vector<1x1xf32> to vector<1x1x1xf32>
    %cst_160 = arith.constant dense<0.000000e+00> : vector<1xf32>
    %401 = vector.multi_reduction <add>, %400, %cst_160 [1, 2] : vector<1x1x1xf32> to vector<1xf32>
    %402 = vector.shape_cast %401 : vector<1xf32> to vector<1x1x1xf32>
    %403 = vector.extract %402[0, 0, 0] : f32 from vector<1x1x1xf32>
    %404 = arith.addf %398, %403 : f32
    %405 = vector.extract_strided_slice %377 {offsets = [1, 0], sizes = [7, 1], strides = [1, 1]} : vector<8x1xf32> to vector<7x1xf32>
    %406 = arith.addf %383, %405 : vector<7x1xf32>
    %407 = vector.extract_strided_slice %374 {offsets = [1, 0], sizes = [7, 1], strides = [1, 1]} : vector<8x1xf32> to vector<7x1xf32>
    %408 = arith.mulf %406, %407 : vector<7x1xf32>
    %409 = vector.shape_cast %408 : vector<7x1xf32> to vector<1x7x1xf32>
    %cst_161 = arith.constant dense<0.000000e+00> : vector<1xf32>
    %410 = vector.multi_reduction <add>, %409, %cst_161 [1, 2] : vector<1x7x1xf32> to vector<1xf32>
    %411 = vector.shape_cast %410 : vector<1xf32> to vector<1x1x1xf32>
    %412 = vector.extract %411[0, 0, 0] : f32 from vector<1x1x1xf32>
    %413 = arith.addf %404, %412 : f32
    %414 = arith.mulf %392, %355 : vector<1x128xf32>
    %415 = vector.shape_cast %414 : vector<1x128xf32> to vector<1x1x128xf32>
    %cst_162 = arith.constant dense<0.000000e+00> : vector<1xf32>
    %416 = vector.multi_reduction <add>, %415, %cst_162 [1, 2] : vector<1x1x128xf32> to vector<1xf32>
    %417 = vector.shape_cast %416 : vector<1xf32> to vector<1x1x1xf32>
    %418 = vector.extract %417[0, 0, 0] : f32 from vector<1x1x1xf32>
    %419 = arith.addf %413, %418 : f32
    %420 = math.exp %353 : vector<8x128xf32>
    %421 = vector.extract_strided_slice %351 {offsets = [0, 0], sizes = [1, 128], strides = [1, 1]} : vector<8x128xf32> to vector<1x128xf32>
    %422 = arith.addf %354, %421 : vector<1x128xf32>
    %c0_163 = arith.constant 0 : index
    %c0_164 = arith.constant 0 : index
    %423 = vector.load %arg10[%c0_163, %c0_164] : memref<1x128xf32, #tpu.memory_space<vmem>>, vector<1x128xf32>
    tpu.vector_store %arg10[%c0_163, %c0_164], %422 {strides = array<i32>} : memref<1x128xf32, #tpu.memory_space<vmem>>, vector<1x128xf32>,
    %c1_i32_165 = arith.constant 1 : i32
    %424 = arith.subi %359, %c1_i32_165 : i32
    %c1_i32_166 = arith.constant 1 : i32
    %c1_i32_167 = arith.constant 1 : i32
    %425 = arith.subi %c1_i32_166, %c1_i32_167 : i32
    %426 = arith.addi %424, %425 : i32
    %c1_i32_168 = arith.constant 1 : i32
    %427 = arith.divsi %426, %c1_i32_168 : i32
    %c1_i32_169 = arith.constant 1 : i32
    %c1_i32_170 = arith.constant 1 : i32
    %c0_i32 = arith.constant 0 : i32
    %428 = arith.subi %427, %c0_i32 : i32
    %429 = arith.addi %c0_i32, %428 : i32
    %c1_i32_171 = arith.constant 1 : i32
    scf.for %arg11 = %c0_i32 to %429 step %c1_i32_171  : i32 {
      %445 = arith.muli %arg11, %c1_i32_169 : i32
      %446 = arith.addi %c1_i32_170, %445 : i32
      %c0_179 = arith.constant 0 : index
      %c0_180 = arith.constant 0 : index
      %447 = vector.load %arg10[%c0_179, %c0_180] : memref<1x128xf32, #tpu.memory_space<vmem>>, vector<1x8xf32>
      %cst_181 = arith.constant dense<0xFF800000> : vector<1xf32>
      %448 = vector.multi_reduction <maximumf>, %447, %cst_181 [1] : vector<1x8xf32> to vector<1xf32>
      %449 = vector.shape_cast %448 : vector<1xf32> to vector<1x1xf32>
      %450 = vector.broadcast %449 : vector<1x1xf32> to vector<1x8xf32>
      %451 = arith.subf %447, %450 : vector<1x8xf32>
      %452 = math.exp %451 : vector<1x8xf32>
      %cst_182 = arith.constant dense<0.000000e+00> : vector<1x128xf32>
      %453 = tpu.matmul %452, %420, %cst_182 {dimension_numbers = #tpu.dot_dimension_numbers<[1], [0], [0], [1], [0, 0, 1, 1], [], []>} : vector<1x8xf32>, vector<8x128xf32>, vector<1x128xf32> -> vector<1x128xf32>
      %454 = arith.index_cast %446 : i32 to index
      %c0_183 = arith.constant 0 : index
      %455 = vector.load %arg9[%454, %c0_183] : memref<8x128xf32, #tpu.memory_space<vmem>>, vector<1x128xf32>
      %cst_184 = arith.constant 1.000000e-30 : f32
      %456 = vector.broadcast %cst_184 : f32 to vector<1x128xf32>
      %457 = arith.maximumf %453, %456 : vector<1x128xf32>
      %458 = math.log %457 : vector<1x128xf32>
      %459 = vector.broadcast %449 : vector<1x1xf32> to vector<1x128xf32>
      %460 = arith.addf %458, %459 : vector<1x128xf32>
      %461 = arith.addf %460, %455 : vector<1x128xf32>
      %c0_185 = arith.constant 0 : index
      %c0_186 = arith.constant 0 : index
      %462 = vector.load %arg10[%c0_185, %c0_186] : memref<1x128xf32, #tpu.memory_space<vmem>>, vector<1x128xf32>
      tpu.vector_store %arg10[%c0_185, %c0_186], %461 {strides = array<i32>} : memref<1x128xf32, #tpu.memory_space<vmem>>, vector<1x128xf32>,
    }
    %c0_172 = arith.constant 0 : index
    %c0_173 = arith.constant 0 : index
    %430 = vector.load %arg10[%c0_172, %c0_173] : memref<1x128xf32, #tpu.memory_space<vmem>>, vector<1x128xf32>
    %431 = arith.addf %430, %355 : vector<1x128xf32>
    %cst_174 = arith.constant dense<0xFF800000> : vector<1xf32>
    %432 = vector.multi_reduction <maximumf>, %431, %cst_174 [1] : vector<1x128xf32> to vector<1xf32>
    %433 = vector.shape_cast %432 : vector<1xf32> to vector<1x1xf32>
    %434 = vector.broadcast %433 : vector<1x1xf32> to vector<1x128xf32>
    %435 = arith.subf %431, %434 : vector<1x128xf32>
    %436 = math.exp %435 : vector<1x128xf32>
    %cst_175 = arith.constant dense<0.000000e+00> : vector<1xf32>
    %437 = vector.multi_reduction <add>, %436, %cst_175 [1] : vector<1x128xf32> to vector<1xf32>
    %438 = vector.shape_cast %437 : vector<1xf32> to vector<1x1xf32>
    %439 = math.log %438 : vector<1x1xf32>
    %440 = arith.addf %439, %433 : vector<1x1xf32>
    %441 = vector.broadcast %419 : f32 to vector<1x1xf32>
    %442 = arith.subf %441, %440 : vector<1x1xf32>
    %443 = vector.shape_cast %442 : vector<1x1xf32> to vector<1x1x1xf32>
    %c0_176 = arith.constant 0 : index
    %c0_177 = arith.constant 0 : index
    %c0_178 = arith.constant 0 : index
    %444 = vector.load %arg8[%c0_176, %c0_177, %c0_178] : memref<1x1x1xf32, #tpu.memory_space<vmem>>, vector<1x1x1xf32>
    tpu.vector_store %arg8[%c0_176, %c0_177, %c0_178], %443 {strides = array<i32>} : memref<1x1x1xf32, #tpu.memory_space<vmem>>, vector<1x1x1xf32>,
    return
  }
  func.func @transform_0(%arg0: i32, %arg1: memref<2xi32, #tpu.memory_space<smem>>) -> (i32, i32, i32) {
    %c0_i32 = arith.constant 0 : i32
    %c0_i32_0 = arith.constant 0 : i32
    %c0_i32_1 = arith.constant 0 : i32
    return %arg0, %c0_i32, %c0_i32_0 : i32, i32, i32
  }
  func.func @transform_1(%arg0: i32, %arg1: memref<2xi32, #tpu.memory_space<smem>>) -> (i32, i32, i32) {
    %c0_i32 = arith.constant 0 : i32
    %c0_i32_0 = arith.constant 0 : i32
    %c0_i32_1 = arith.constant 0 : i32
    return %arg0, %c0_i32, %c0_i32_0 : i32, i32, i32
  }
  func.func @transform_2(%arg0: i32, %arg1: memref<2xi32, #tpu.memory_space<smem>>) -> (i32, i32, i32) {
    %c0_i32 = arith.constant 0 : i32
    %c0_i32_0 = arith.constant 0 : i32
    %c0_i32_1 = arith.constant 0 : i32
    %c0_i32_2 = arith.constant 0 : i32
    return %c0_i32, %c0_i32_0, %c0_i32_1 : i32, i32, i32
  }
  func.func @transform_3(%arg0: i32, %arg1: memref<2xi32, #tpu.memory_space<smem>>) -> (i32, i32, i32) {
    %c0_i32 = arith.constant 0 : i32
    %c0_i32_0 = arith.constant 0 : i32
    %c0_i32_1 = arith.constant 0 : i32
    %c0_i32_2 = arith.constant 0 : i32
    return %c0_i32, %c0_i32_0, %c0_i32_1 : i32, i32, i32
  }
  func.func @transform_4(%arg0: i32, %arg1: memref<2xi32, #tpu.memory_space<smem>>) -> (i32, i32) {
    %c0_i32 = arith.constant 0 : i32
    %c0_i32_0 = arith.constant 0 : i32
    %c0_i32_1 = arith.constant 0 : i32
    return %c0_i32, %c0_i32_0 : i32, i32
  }
  func.func @transform_5(%arg0: i32, %arg1: memref<2xi32, #tpu.memory_space<smem>>) -> (i32, i32) {
    %c0_i32 = arith.constant 0 : i32
    %c0_i32_0 = arith.constant 0 : i32
    %c0_i32_1 = arith.constant 0 : i32
    return %c0_i32, %c0_i32_0 : i32, i32
  }
  func.func @transform_6(%arg0: i32, %arg1: memref<2xi32, #tpu.memory_space<smem>>) -> (i32, i32, i32) {
    %c0_i32 = arith.constant 0 : i32
    %c0_i32_0 = arith.constant 0 : i32
    %c0_i32_1 = arith.constant 0 : i32
    return %arg0, %c0_i32, %c0_i32_0 : i32, i32, i32
  }
}

</mosaic_0001>

<bundles_post_ra>
// kernel: tpu_custom_call.1
= control target key start
LH: loop header
LB: loop body
LE: loop exit
PB: predicated region body
PF: predicated region fallthrough
CT: control target
= control target key end

     0   :  { %s4026_s0 = inlined_call_operand.vmem [shape: s32[2], index: 0, kind: input, shape index: {}]   ;;  %s4027_s1 = inlined_call_operand.vmem [shape: f32[2,8,32], index: 1, kind: input, shape index: {}]   ;;  %s4028_s2 = inlined_call_operand.vmem [shape: s32[2,8,1], index: 2, kind: input, shape index: {}]   ;;  %s4029_s3 = inlined_call_operand.hbm [shape: bf16[2,224,128], index: 3, kind: input, shape index: {}]   ;;  %s4030_s4 = inlined_call_operand.vmem [shape: f32[2,8,128], index: 4, kind: input, shape index: {}]   ;;  %s4031_s5 = inlined_call_operand.hbm [shape: bf16[32,128], index: 5, kind: input, shape index: {}]   ;;  %s4032_s6 = inlined_call_operand.hbm [shape: f32[16,128], index: 6, kind: input, shape index: {}]   ;;  %s4033_s7 = inlined_call_operand.vmem [shape: f32[2,1,1], index: 7, kind: output, shape index: {}]  }
   0x1   :  { %s12_s26 = sshll.u32 %s4026_s0, 4  ;;  %s13_s26 = int_to_ptr.vmem [resolvable:$true] %s12_s26 }
   0x2   :  { %s3368_s27 = scalar_lea.vmem %s13_s26, 16  ;;  %p3373_p1 = scmp.lt.s32.totalorder %s13_s26, %s13_s26 }
   0x3   :  { %p3369_p0 = scmp.ne.s32.totalorder %s13_s26, %s3368_s27  ;;  %p3374_p2 = scmp.lt.s32.totalorder %s3368_s27, %s3368_s27 }
   0x5   :  { %p3375_p3 = por %p3374_p2, %p3373_p1 }
   0x7   :  { %p3376_p4 = pnand %p3375_p3, %p3369_p0 }
   0x9   :  { %3379 = shalt.err (!%p3376_p4)  }
   0xa   :  { %s3490_s28 = smov [#allocation5]  }
   0xb   :  { %15 = dma.vmem_to_smem %s13_s26, 16, %s3490_s28, [#allocation4] }
   0xc   :  { %3472 = dma.done.wait [#allocation4], 16 }
   0xd   :  { %3473 = vsyncadd [#allocation4], 4294967280 }
   0xe   :  { %17 = sfence }
   0xf   :  { %18 = vsyncpa [#allocation7], 0 }
  0x10   :  { %19 = vsyncpa [#allocation9], 0  ;;  %s3561_s29 = smov 0  }
  0x11 LB: > { %s3567_s0 = sadd.s32 4294967295, %s3484_s29   ;;  %p2844_p5 = scmp.ge.s32.totalorder %s3484_s29, 1  ;;  %s3484_s29 = sphi %s3561_s29, %s25_s29  }
  0x12   : > { %p192_p6 = scmp.lt.s32.totalorder %s3484_s29, 3  ;;  %p3233_p7 = scmp.eq.s32.totalorder %s3567_s0, 0 }
  0x13   : > { %s3491_s8 = smov [#allocation8]   ;;  %s3492_s10 = smov [#allocation6]  }
  0x14   : > { %p3572_p8 = pnand %p2844_p5, %p192_p6  ;;  %s220_s9 = sshll.u32 %s3491_s8, 4  ;;  %s3576_s9 = int_to_ptr.vmem [resolvable:$true] %s220_s9 }
  0x15   : > { %s204_s11 = sshll.u32 %s3492_s10, 4  ;;  %s3493_s13 = smov [#allocation10]   ;;  %s3580_s11 = int_to_ptr.vmem [resolvable:$true] %s204_s11 }
  0x16   : > { %p3223_p9 = pneg %p3572_p8  ;;  %s233_s14 = sshll.u32 %s3493_s13, 4  ;;  %s3588_s14 = int_to_ptr.vmem [resolvable:$true] %s233_s14 }
  0x17   : > { %s3380_s17 = scalar_lea.hbm %s4031_s5, 256 }
  0x18   : > { %p3584_p10 = pnand %p3233_p7, %p3223_p9  ;;  %p3381_p11 = scmp.ne.s32.totalorder %s4031_s5, %s3380_s17 }
  0x19   : > { %p3387_p1 = scmp.lt.u32.totalorder %s3380_s17, %s4031_s5 }
  0x1a   : > { %p3598_p12 = pneg %p3584_p10 }
  0x1c   : > { %p3383_p13 = pnand %p3598_p12, %p3381_p11 }
  0x1e   : > { %p3384_p0 = pneg %p3383_p13 }
  0x20   : > { %p3389_p2 = pnand %p3387_p1, %p3384_p0 }
  0x22   : > { %3392 = shalt.err (!%p3389_p2)
}
  0x23   : > { %s3393_s23 = scalar_lea.vmem %s3576_s9, 256  ;;  %p3401_p6 = scmp.lt.s32.totalorder %s3576_s9, %s3576_s9 }
  0x24   : > { %p3394_p3 = scmp.ne.s32.totalorder %s3576_s9, %s3393_s23  ;;  %p3402_p9 = scmp.lt.s32.totalorder %s3393_s23, %s3393_s23 }
  0x26   : > { %p3396_p4 = pnand %p3394_p3, %p3598_p12  ;;  %p3403_p11 = por %p3402_p9, %p3401_p6 }
  0x28   : > { %p3397_p5 = pneg %p3396_p4 }
  0x2a   : > { %p3404_p13 = pnand %p3403_p11, %p3397_p5 }
  0x2c   : > { %3407 = shalt.err (!%p3404_p13)
}
  0x2d   : > { %s3494_s24 = smov 64   ;;  %s3495_s25 = smov 4  }
  0x2e   : > { %3229 = dma.hbm_to_vmem [thread:$0]  (!%p3584_p10), %s4031_s5, 256, %s3576_s9, [#allocation9], %s3494_s24, %s3494_s24, %s3495_s25  }
  0x2f   : > { %s3408_s10 = scalar_lea.hbm %s4029_s3, 3584 }
  0x30   : > { %p3409_p0 = scmp.ne.s32.totalorder %s4029_s3, %s3408_s10  ;;  %p3415_p3 = scmp.lt.u32.totalorder %s3408_s10, %s4029_s3 }
  0x32   : > { %p3411_p1 = pnand %p3409_p0, %p3598_p12 }
  0x34   : > { %p3412_p2 = pneg %p3411_p1 }
  0x36   : > { %p3417_p4 = pnand %p3415_p3, %p3412_p2 }
  0x38   : > { %3420 = shalt.err (!%p3417_p4)
}
  0x39   : > { %s3421_s9 = scalar_lea.vmem %s3580_s11, 3584  ;;  %p3429_p11 = scmp.lt.s32.totalorder %s3580_s11, %s3580_s11 }
  0x3a   : > { %p3422_p5 = scmp.ne.s32.totalorder %s3580_s11, %s3421_s9  ;;  %p3430_p13 = scmp.lt.s32.totalorder %s3421_s9, %s3421_s9 }
  0x3c   : > { %p3424_p6 = pnand %p3422_p5, %p3598_p12  ;;  %p3431_p0 = por %p3430_p13, %p3429_p11 }
  0x3e   : > { %p3425_p9 = pneg %p3424_p6 }
  0x40   : > { %p3432_p1 = pnand %p3431_p0, %p3425_p9 }
  0x42   : > { %3435 = shalt.err (!%p3432_p1)
}
  0x43   : > { %3226 = dma.hbm_to_vmem [thread:$0]  (!%p3584_p10), %s4029_s3, 3584, %s3580_s11, [#allocation7], %s3494_s24, %s3494_s24, %s3495_s25  }
  0x44   : > { %s3436_s23 = scalar_lea.hbm %s4032_s6, 256 }
  0x45   : > { %p3437_p2 = scmp.ne.s32.totalorder %s4032_s6, %s3436_s23  ;;  %p3443_p5 = scmp.lt.u32.totalorder %s3436_s23, %s4032_s6 }
  0x47   : > { %p3439_p3 = pnand %p3437_p2, %p3598_p12 }
  0x49   : > { %p3440_p4 = pneg %p3439_p3 }
  0x4b   : > { %p3445_p6 = pnand %p3443_p5, %p3440_p4 }
  0x4d   : > { %3448 = shalt.err (!%p3445_p6)
}
  0x4e   : > { %s3449_s11 = scalar_lea.vmem %s3588_s14, 256  ;;  %p3457_p0 = scmp.lt.s32.totalorder %s3588_s14, %s3588_s14 }
  0x4f   : > { %p3450_p9 = scmp.ne.s32.totalorder %s3588_s14, %s3449_s11  ;;  %p3458_p1 = scmp.lt.s32.totalorder %s3449_s11, %s3449_s11 }
  0x51   : > { %p3452_p11 = pnand %p3450_p9, %p3598_p12  ;;  %p3459_p2 = por %p3458_p1, %p3457_p0 }
  0x53   : > { %p3453_p13 = pneg %p3452_p11 }
  0x55   : > { %p3460_p3 = pnand %p3459_p2, %p3453_p13 }
  0x57   : > { %3463 = shalt.err (!%p3460_p3)
}
  0x58   : > { %s3496_s24 = smov 128   ;;  %s3497_s25 = smov 8  }
  0x59   : > { %3232 = dma.hbm_to_vmem [thread:$0]  (!%p3584_p10), %s4032_s6, 256, %s3588_s14, [#allocation9], %s3496_s24, %s3496_s24, %s3497_s25  }
  0x5a   : > { %263 = sbr.rel (%p3572_p8) target bundleno = 8000 (0x1f40), region = 44 }
  0x61   : > { %3475 = dma.done.wait (%p3233_p7), [#allocation7], 3584  }
  0x62   : > { %3477 = vsyncadd (%p3233_p7), [#allocation7], 4294963712 }
  0x63   : > { %3479 = dma.done.wait (%p3233_p7), [#allocation9], 512  }
  0x64   : > { %3481 = vsyncadd (%p3233_p7), [#allocation9], 4294966784  ;;  %p302_p12 = scmp.lt.s32.totalorder %s3567_s0, 1  ;;  %v3498_v0 = vmov 0.0   ;;  %vm3499_vm0 = vmmov 0   ;;  %v3284_v1 = vld [vmem:[#allocation6] sm:$0xff]  }
  0x65   : > { %3017 = vmatprep.subr.bf16.mxu0 %v3498_v0  ;;  %3021 = vmatprep.mubr.msk.bf16.mxu0 %vm3499_vm0, %v3498_v0  ;;  %v3285_v2 = vld [vmem:[#allocation6 + $0x8] sm:$0xff]   ;;  %vm365_vm1 = vcmask 261120   ;;  %v2855_v5 = vld [vmem:[%s4030_s4] ss:$0 sm:$0xff]  ;;  %s3500_s21 = smov 64   ;;  %s3501_s22 = smov 96  }
  0x66   : > { %s3680_s30 = scalar_select %p302_p12, %s3567_s0, 1  ;;  %3025 = vmatprep.subr.mxu1 %v3498_v0  ;;  %3027 = vmatprep.mubr.msk.f32.mxu1 %vm3499_vm0, %v3498_v0  ;;  %vm412_vm2 = vcmask 64512   ;;  %vm1086_vm3 = vcmask 130048   ;;  %vm1088_vm4 = vcmask 195584   ;;  %vm2581_vm7 = vcmask 1040384  }
  0x67   : > { %3018 = vmatpush3.bf16.msra.mxu0 %v3284_v1  ;;  %s3502_s23 = smov 88   ;;  %s3503_s26 = smov 120   ;;  %vm2564_vm8 = vcmask 1046528   ;;  %vm2603_vm10 = vcmask 6144  }
  0x68   : > { %s2853_s12 = sshll.u32 %s3680_s30, 3  ;;  %s312_s15 = scalar_lea.vmem %s4033_s7, %s3680_s30  ;;  %3019 = vmatprep.subr.bf16.mxu0 %v3498_v0 }
  0x69   : > { %s305_s9 = scalar_lea.vmem %s4027_s1, %s2853_s12  ;;  %s3504_s27 = smov 80  }
  0x6a   : > { %v3695_v3 = vld [vmem:[%s305_s9] sm:$0xff]  ;;  %s3505_s28 = smov 72   ;;  %s3506_s8 = smov 112  }
  0x6b   : > { %v348_v4 = vpack.c.bf16 %v3695_v3, %v3695_v3  ;;  %3020 = vmatpush3.bf16.msra.mxu0 %v3285_v2  ;;  %s3507_s11 = smov 104   ;;  %s3508_s24 = smov 56  }
  0x6c   : > { %3040 = vmatprep.subr.mxu0 %v3498_v0  ;;  %s3509_s25 = smov 40   ;;  %s3510_s10 = smov 48  }
  0x6d   : > { %s3511_s13 = smov 8   ;;  %s3512_s14 = smov 16  }
  0x6e   : > { %3022 = vmatmul.mubr.msk.bf16.vlgmr.msra.gmra.mrb[0].mxu0 %vm365_vm1, %v348_v4  ;;  %s3513_s20 = smov 24   ;;  %s3514_s18 = smov 32  }
  0x6f   : > { %3042 = vmatprep.mubr.msk.f32.mxu0 %vm3499_vm0, %v3498_v0 }
 0x141   : > { %v403_v6 = vpop.f32.mrb[0].mxu0 }
 0x142   : > { %v3707_v7 = vadd.f32 %v2855_v5, %v403_v6  ;;  %v3023_v8 = vpop.f32.mrb[1].mxu0 }
 0x143   : > { %v406_v9 = vpop.f32.mrb[2].mxu0 }
 0x144   : > { %499 = vrot.lane.b32.xlu1 %v3707_v7, %s3500_s21  ;;  %410 = vrot.lane.b32.xlu0 %v3707_v7, %s3501_s22  ;;  %v3024_v10 = vpop.f32.mrb[3].mxu0 }
 0x145   : > { %v3286_v10 = vld [vmem:[#allocation6 + $0x10] sm:$0xff]  }
 0x148   : > { %577 = vrot.lane.b32.xlu1 %v3707_v7, %s3502_s23 }
 0x14c   : > { %575 = vrot.lane.b32.xlu1 %v3707_v7, %s3503_s26 }
 0x150   : > { %743 = vrot.lane.b32.xlu1 %v3707_v7, %s3504_s27 }
 0x1b6   : > { %v411_v11 = vpop.permute.xlu0 %410  ;;  %v500_v12 = vpop.permute.xlu1 %499 }
 0x1b7   : > { %3026 = vmatpush3.xpose.msk.msra.mxu1 %vm412_vm2, %v411_v11  ;;  %v3287_v11 = vld [vmem:[#allocation6 + $0x18] sm:$0xff]  }
 0x1b8   : > { %3030 = vmatprep.subr.mxu1 %v3498_v0 }
 0x1ba   : > { %3028 = vmatmul.mubr.msk.f32.vlgmr.msra.gmra.mrb[0].mxu1 %vm412_vm2, %v3707_v7  ;;  %v578_v22 = vpop.permute.xlu1 %577 }
 0x1bb   : > { %3031 = vmatpush3.msra.mxu1 %v500_v12  ;;  %3032 = vmatprep.mubr.msk.f32.mxu1 %vm3499_vm0, %v3498_v0 }
 0x1bc   : > { %3035 = vmatprep.subr.mxu1 %v3498_v0 }
 0x1be   : > { %v576_v23 = vpop.permute.xlu1 %575 }
 0x1c2   : > { %v744_v24 = vpop.permute.xlu1 %743 }
 0x28d   : > { %v483_v13 = vpop.f32.mrb[0].mxu1 }
 0x28e   : > { %v487_v14 = vmul.f32 0.35355338, %v483_v13  ;;  %v3029_v15 = vpop.f32.mrb[1].mxu1 }
 0x290   : > { %v488_v16 = vsel %vm412_vm2, %v487_v14, -inf }
 0x291   : > { %489 = vmax.xlane.f32.xlu0 %v488_v16 }
 0x2a7   : > { %909 = vrot.lane.b32.xlu0 %v3707_v7, %s3505_s28 }
 0x31e   : > { %v490_v17 = vpop.xlane.xlu0 %489 }
 0x31f   : > { %v491_v18 = vsub.f32 %v487_v14, %v490_v17 }
 0x321   : > { %v492_v19 = vmul.f32 1.442695, %v491_v18 }
 0x322   : > { %v910_v29 = vpop.permute.xlu0 %909 }
 0x323   : > { %3314 = vpow2.f32 %v492_v19 }
 0x32d   : > { %v3315_v20 = vpop.eup %3314 }
 0x32e   : > { %v494_v21 = vsel %vm412_vm2, %v3315_v20, 0.0 }
 0x32f   : > { %495 = vadd.xlane.f32.xlu1 %v494_v21 }
 0x340   : > { %741 = vrot.lane.b32.xlu1 %v3707_v7, %s3506_s8 }
 0x344   : > { %907 = vrot.lane.b32.xlu1 %v3707_v7, %s3507_s11 }
 0x3bc   : > { %v496_v25 = vpop.xlane.xlu1 %495 }
 0x3bd   : > { %3316 = vrcp.f32 %v496_v25  ;;  %v2871_v25 = vld [vmem:[%s4030_s4 + $0x1] ss:$0 sm:$0xff] }
 0x3c0   : > { %v742_v28 = vpop.permute.xlu1 %741 }
 0x3c4   : > { %v908_v30 = vpop.permute.xlu1 %907 }
 0x3c7   : > { %v3317_v26 = vpop.eup %3316 }
 0x3c8   : > { %v498_v27 = vmul.f32 %v3317_v26, %v3315_v20 }
 0x3ca   : > { %3033 = vmatmul.mubr.msk.f32.vlgmr.msra.gmra.mrb[2].mxu1 %vm412_vm2, %v498_v27 }
 0x3cb   : > { %3036 = vmatpush3.xpose.msk.msra.mxu1 %vm412_vm2, %v578_v22  ;;  %3037 = vmatprep.mubr.msk.f32.mxu1 %vm3499_vm0, %v3498_v0 }
 0x3cc   : > { %3045 = vmatprep.subr.mxu1 %v3498_v0 }
 0x3ce   : > { %3038 = vmatmul.mubr.msk.f32.vlgmr.msra.gmra.mrb[4].mxu1 %vm412_vm2, %v576_v23 }
 0x3cf   : > { %3046 = vmatpush3.xpose.msk.msra.mxu1 %vm412_vm2, %v744_v24  ;;  %3047 = vmatprep.mubr.msk.f32.mxu1 %vm3499_vm0, %v3498_v0 }
 0x3d0   : > { %3055 = vmatprep.subr.mxu1 %v3498_v0 }
 0x3d2   : > { %3048 = vmatmul.mubr.msk.f32.vlgmr.msra.gmra.mrb[6].mxu1 %vm412_vm2, %v742_v28 }
 0x3d3   : > { %3056 = vmatpush3.xpose.msk.msra.mxu1 %vm412_vm2, %v910_v29  ;;  %3057 = vmatprep.mubr.msk.f32.mxu1 %vm3499_vm0, %v3498_v0 }
 0x3d4   : > { %3081 = vmatprep.subr.bf16.mxu1 %v3498_v0 }
 0x3d6   : > { %3058 = vmatmul.mubr.msk.f32.vlgmr.msra.gmra.mrb[8].mxu1 %vm412_vm2, %v908_v30 }
 0x3d7   : > { %3097 = vmatprep.mubr.msk.bf16.mxu1 %vm3499_vm0, %v3498_v0 }
 0x49d   : > { %v3752_v31 = vpop.f32.mrb[2].mxu1 }
 0x49e   : > { %v3034_v32 = vpop.f32.mrb[3].mxu1 }
 0x4a1   : > { %v649_v33 = vpop.f32.mrb[4].mxu1 }
 0x4a2   : > { %v653_v34 = vmul.f32 0.35355338, %v649_v33  ;;  %v3039_v35 = vpop.f32.mrb[5].mxu1  ;;  %v3798_v33 = vld [vmem:[%s4030_s4 + $0x2] ss:$0 sm:$0xff] }
 0x4a4   : > { %v654_v36 = vsel %vm412_vm2, %v653_v34, -inf }
 0x4a5   : > { %655 = vmax.xlane.f32.xlu1 %v654_v36  ;;  %v815_v37 = vpop.f32.mrb[6].mxu1 }
 0x4a6   : > { %v819_v38 = vmul.f32 0.35355338, %v815_v37  ;;  %v3049_v39 = vpop.f32.mrb[7].mxu1 }
 0x4a7   : > { %v3288_v39 = vld [vmem:[#allocation6 + $0x20] sm:$0xff]  }
 0x4a8   : > { %v820_v40 = vsel %vm412_vm2, %v819_v38, -inf }
 0x4a9   : > { %821 = vmax.xlane.f32.xlu0 %v820_v40  ;;  %v981_v41 = vpop.f32.mrb[8].mxu1  ;;  %v3290_v40 = vld [vmem:[#allocation6 + $0x30] sm:$0xff]  }
 0x4aa   : > { %v985_v42 = vmul.f32 0.35355338, %v981_v41  ;;  %v3059_v43 = vpop.f32.mrb[9].mxu1  ;;  %3082 = vmatpush3.bf16.msra.mxu1 %v3290_v40 }
 0x4ab   : > { %3083 = vmatprep.subr.bf16.mxu1 %v3498_v0 }
 0x4ac   : > { %v986_v44 = vsel %vm412_vm2, %v985_v42, -inf }
 0x4ad   : > { %987 = vmax.xlane.f32.xlu1 %v986_v44 }
 0x4be   : > { %665 = vrot.lane.b32.xlu1 %v3707_v7, %s3508_s24 }
 0x532   : > { %v656_v45 = vpop.xlane.xlu1 %655 }
 0x533   : > { %v657_v46 = vsub.f32 %v653_v34, %v656_v45 }
 0x535   : > { %v658_v47 = vmul.f32 1.442695, %v657_v46 }
 0x536   : > { %v822_v48 = vpop.xlane.xlu0 %821 }
 0x537   : > { %3318 = vpow2.f32 %v658_v47  ;;  %v823_v49 = vsub.f32 %v819_v38, %v822_v48 }
 0x539   : > { %v824_v50 = vmul.f32 1.442695, %v823_v49 }
 0x53a   : > { %v988_v51 = vpop.xlane.xlu1 %987 }
 0x53b   : > { %3320 = vpow2.f32 %v824_v50  ;;  %v989_v52 = vsub.f32 %v985_v42, %v988_v51  ;;  %v3291_v50 = vld [vmem:[#allocation6 + $0x38] sm:$0xff]   ;;  %v3292_v51 = vld [vmem:[#allocation6 + $0x40] sm:$0xff]  }
 0x53c   : > { %3084 = vmatpush3.bf16.msra.mxu1 %v3291_v50 }
 0x53d   : > { %v990_v53 = vmul.f32 1.442695, %v989_v52  ;;  %3085 = vmatprep.subr.bf16.mxu1 %v3498_v0  ;;  %v3293_v52 = vld [vmem:[#allocation6 + $0x48] sm:$0xff]  }
 0x53e   : > { %v666_v54 = vpop.permute.xlu1 %665 }
 0x53f   : > { %3322 = vpow2.f32 %v990_v53  ;;  %3041 = vmatpush3.msra.mxu0 %v666_v54  ;;  %v3294_v53 = vld [vmem:[#allocation6 + $0x50] sm:$0xff]   ;;  %v3295_v54 = vld [vmem:[#allocation6 + $0x58] sm:$0xff]  }
 0x540   : > { %3050 = vmatprep.subr.mxu0 %v3498_v0  ;;  %3086 = vmatpush3.bf16.msra.mxu1 %v3292_v51 }
 0x541   : > { %v3319_v55 = vpop.eup %3318  ;;  %3087 = vmatprep.subr.bf16.mxu1 %v3498_v0 }
 0x542   : > { %v660_v56 = vsel %vm412_vm2, %v3319_v55, 0.0 }
 0x543   : > { %661 = vadd.xlane.f32.xlu1 %v660_v56  ;;  %v3297_v56 = vld [vmem:[#allocation6 + $0x68] sm:$0xff]  }
 0x544   : > { %3088 = vmatpush3.bf16.msra.mxu1 %v3293_v52 }
 0x545   : > { %v3321_v57 = vpop.eup %3320  ;;  %3089 = vmatprep.subr.bf16.mxu1 %v3498_v0 }
 0x546   : > { %v826_v58 = vsel %vm412_vm2, %v3321_v57, 0.0 }
 0x547   : > { %827 = vadd.xlane.f32.xlu1 %v826_v58 }
 0x548   : > { %3090 = vmatpush3.bf16.msra.mxu1 %v3294_v53 }
 0x549   : > { %v3323_v59 = vpop.eup %3322  ;;  %3091 = vmatprep.subr.bf16.mxu1 %v3498_v0 }
 0x54a   : > { %v992_v60 = vsel %vm412_vm2, %v3323_v59, 0.0 }
 0x54b   : > { %993 = vadd.xlane.f32.xlu0 %v992_v60 }
 0x54c   : > { %3092 = vmatpush3.bf16.msra.mxu1 %v3295_v54 }
 0x54d   : > { %3093 = vmatprep.subr.bf16.mxu1 %v3498_v0 }
 0x558   : > { %997 = vrot.lane.b32.xlu1 %v3707_v7, %s3509_s25 }
 0x561   : > { %831 = vrot.lane.b32.xlu0 %v3707_v7, %s3510_s10 }
 0x5d0   : > { %v662_v61 = vpop.xlane.xlu1 %661 }
 0x5d1   : > { %3324 = vrcp.f32 %v662_v61 }
 0x5d4   : > { %v828_v62 = vpop.xlane.xlu1 %827 }
 0x5d5   : > { %3326 = vrcp.f32 %v828_v62 }
 0x5d8   : > { %v994_v63 = vpop.xlane.xlu0 %993  ;;  %v998_v7 = vpop.permute.xlu1 %997 }
 0x5d9   : > { %3328 = vrcp.f32 %v994_v63 }
 0x5db   : > { %v3325_v1 = vpop.eup %3324 }
 0x5dc   : > { %v664_v2 = vmul.f32 %v3325_v1, %v3319_v55  ;;  %v832_v4 = vpop.permute.xlu0 %831  ;;  %v3296_v55 = vld [vmem:[#allocation6 + $0x60] sm:$0xff]  }
 0x5dd   : > { %3094 = vmatpush3.bf16.msra.mxu1 %v3296_v55 }
 0x5de   : > { %3043 = vmatmul.mubr.msk.f32.vlgmr.msra.gmra.mrb[4].mxu0 %vm412_vm2, %v664_v2  ;;  %3095 = vmatprep.subr.bf16.mxu1 %v3498_v0 }
 0x5df   : > { %v3327_v5 = vpop.eup %3326  ;;  %3051 = vmatpush3.msra.mxu0 %v832_v4  ;;  %3052 = vmatprep.mubr.msk.f32.mxu0 %vm3499_vm0, %v3498_v0 }
 0x5e0   : > { %v830_v6 = vmul.f32 %v3327_v5, %v3321_v57  ;;  %3060 = vmatprep.subr.mxu0 %v3498_v0  ;;  %v2876_v57 = vld [vmem:[%s4030_s4 + $0x3] ss:$0 sm:$0xff] }
 0x5e1   : > { %3096 = vmatpush3.bf16.msra.mxu1 %v3297_v56 }
 0x5e2   : > { %3053 = vmatmul.mubr.msk.f32.vlgmr.msra.gmra.mrb[6].mxu0 %vm412_vm2, %v830_v6  ;;  %3139 = vmatprep.subr.mxu1 %v3498_v0 }
 0x5e3   : > { %v3329_v8 = vpop.eup %3328  ;;  %3061 = vmatpush3.msra.mxu0 %v998_v7  ;;  %3062 = vmatprep.mubr.msk.f32.mxu0 %vm3499_vm0, %v3498_v0 }
 0x5e4   : > { %v996_v9 = vmul.f32 %v3329_v8, %v3323_v59  ;;  %3065 = vmatprep.subr.bf16.mxu0 %v3498_v0 }
 0x5e6   : > { %3063 = vmatmul.mubr.msk.f32.vlgmr.msra.gmra.mrb[8].mxu0 %vm412_vm2, %v996_v9 }
 0x5e7   : > { %3069 = vmatprep.mubr.msk.bf16.mxu0 %vm3499_vm0, %v3498_v0  ;;  %3066 = vmatpush3.bf16.msra.mxu0 %v3286_v10 }
 0x5e8   : > { %3067 = vmatprep.subr.bf16.mxu0 %v3498_v0 }
 0x5eb   : > { %3068 = vmatpush3.bf16.msra.mxu0 %v3287_v11  ;;  %v2880_v11 = vld [vmem:[%s4030_s4 + $0x4] ss:$0 sm:$0xff] }
 0x5ec   : > { %3073 = vmatprep.subr.bf16.mxu0 %v3498_v0 }
 0x6b1   : > { %v737_v12 = vpop.f32.mrb[4].mxu0 }
 0x6b2   : > { %1074 = vrot.lane.b32.xlu1 %v737_v12, %s3511_s13  ;;  %v3044_v13 = vpop.f32.mrb[5].mxu0 }
 0x6b5   : > { %v903_v14 = vpop.f32.mrb[6].mxu0 }
 0x6b6   : > { %1078 = vrot.lane.b32.xlu0 %v903_v14, %s3512_s14  ;;  %v3054_v15 = vpop.f32.mrb[7].mxu0 }
 0x6b9   : > { %v1069_v16 = vpop.f32.mrb[8].mxu0 }
 0x6ba   : > { %1082 = vrot.lane.b32.xlu1 %v1069_v16, %s3513_s20  ;;  %v3064_v17 = vpop.f32.mrb[9].mxu0 }
 0x724   : > { %v1075_v18 = vpop.permute.xlu1 %1074 }
 0x725   : > { %v1085_v20 = vsel %vm412_vm2, %v3752_v31, %v1075_v18 }
 0x728   : > { %v1079_v19 = vpop.permute.xlu0 %1078 }
 0x729   : > { %v1087_v21 = vsel %vm1086_vm3, %v1085_v20, %v1079_v19 }
 0x72c   : > { %v1083_v22 = vpop.permute.xlu1 %1082 }
 0x72d   : > { %v1089_v23 = vsel %vm1088_vm4, %v1087_v21, %v1083_v22 }
 0x72e   : > { %v1090_v24 = vpack.c.bf16 %v1089_v23, %v1089_v23 }
 0x730   : > { %3070 = vmatmul.mubr.msk.bf16.vlgmr.msra.gmra.mrb[12].mxu0 %vm365_vm1, %v1090_v24  ;;  %v3298_v24 = vld [vmem:[#allocation6 + $0x70] sm:$0xff]  }
 0x731   : > { %3077 = vmatprep.mubr.msk.bf16.mxu0 %vm3499_vm0, %v3498_v0  ;;  %3074 = vmatpush3.bf16.msra.mxu0 %v3288_v39 }
 0x732   : > { %3075 = vmatprep.subr.bf16.mxu0 %v3498_v0 }
 0x803   : > { %v1144_v26 = vpop.f32.mrb[12].mxu0 }
 0x804   : > { %v1145_v27 = vadd.f32 %v2871_v25, %v1144_v26  ;;  %v3071_v28 = vpop.f32.mrb[13].mxu0  ;;  %v3299_v25 = vld [vmem:[#allocation6 + $0x78] sm:$0xff]  }
 0x805   : > { %v1147_v29 = vpop.f32.mrb[14].mxu0 }
 0x806   : > { %v3072_v30 = vpop.f32.mrb[15].mxu0  ;;  %v1150_v31 = vadd.f32 %v1145_v27, %v3695_v3  ;;  %v3289_v3 = vld [vmem:[#allocation6 + $0x28] sm:$0xff]  }
 0x807   : > { %3076 = vmatpush3.bf16.msra.mxu0 %v3289_v3 }
 0x808   : > { %v1151_v32 = vsel %vm365_vm1, %v1150_v31, 0.0  ;;  %3101 = vmatprep.subr.bf16.mxu0 %v3498_v0 }
 0x809   : > { %1152 = vadd.xlane.f32.xlu0 %v1151_v32 }
 0x81f   : > { %1171 = vrot.lane.b32.xlu0 %v3798_v33, %s3501_s22 }
 0x823   : > { %1355 = vrot.lane.b32.xlu0 %v3798_v33, %s3514_s18 }
 0x896   : > { %v1153_v34 = vpop.xlane.xlu0 %1152 }
 0x897   : > { %v1155_v35 = vmul.f32 0.03125, %v1153_v34 }
 0x899   : > { %v1156_v36 = vsub.f32 %v1150_v31, %v1155_v35 }
 0x89a   : > { %v1172_v46 = vpop.permute.xlu0 %1171 }
 0x89b   : > { %v1157_v37 = vmul.f32 %v1156_v36, %v1156_v36 }
 0x89d   : > { %v1158_v38 = vsel %vm365_vm1, %v1157_v37, 0.0 }
 0x89e   : > { %1159 = vadd.xlane.f32.xlu1 %v1158_v38  ;;  %v1356_v32 = vpop.permute.xlu0 %1355 }
 0x92b   : > { %v1160_v41 = vpop.xlane.xlu1 %1159 }
 0x92c   : > { %v1161_v42 = vmul.f32 0.03125, %v1160_v41 }
 0x92e   : > { %v1162_v43 = vadd.f32 1e-05, %v1161_v42 }
 0x930   : > { %3330 = vrsqrt.f32 %v1162_v43 }
 0x93a   : > { %v3331_v44 = vpop.eup %3330 }
 0x93b   : > { %v1164_v45 = vmul.f32 %v3331_v44, %v1156_v36  ;;  %v2894_v36 = vld [vmem:[%s4030_s4 + $0x8] ss:$0 sm:$0xff] }
 0x93d   : > { %v1169_v47 = vmul.f32 %v3798_v33, %v1164_v45 }
 0x93f   : > { %v1174_v48 = vadd.f32 %v1172_v46, %v1169_v47 }
 0x941   : > { %v1175_v49 = vpack.c.bf16 %v1174_v48, %v1174_v48 }
 0x943   : > { %3078 = vmatmul.mubr.msk.bf16.vlgmr.msra.gmra.mrb[16].mxu0 %vm365_vm1, %v1175_v49 }
 0x944   : > { %3105 = vmatprep.mubr.msk.bf16.mxu0 %vm3499_vm0, %v3498_v0  ;;  %3102 = vmatpush3.bf16.msra.mxu0 %v3298_v24 }
 0x945   : > { %3103 = vmatprep.subr.bf16.mxu0 %v3498_v0 }
 0x948   : > { %3104 = vmatpush3.bf16.msra.mxu0 %v3299_v25 }
 0x949   : > { %3109 = vmatprep.subr.mxu0 %v3498_v0 }
 0xa16   : > { %v1229_v58 = vpop.f32.mrb[16].mxu0 }
 0xa17   : > { %v1230_v59 = vadd.f32 %v2876_v57, %v1229_v58  ;;  %v3079_v60 = vpop.f32.mrb[17].mxu0 }
 0xa18   : > { %v1232_v61 = vpop.f32.mrb[18].mxu0 }
 0xa19   : > { %v1236_v62 = vmul.f32 0.044715, %v1230_v59  ;;  %v3080_v63 = vpop.f32.mrb[19].mxu0  ;;  %v1235_v7 = vmul.f32 0.5, %v1230_v59 }
 0xa1b   : > { %v1237_v1 = vmul.f32 %v1236_v62, %v1230_v59 }
 0xa1d   : > { %v1238_v2 = vmul.f32 %v1237_v1, %v1230_v59 }
 0xa1f   : > { %v1239_v4 = vadd.f32 %v1238_v2, %v1230_v59 }
 0xa21   : > { %v1240_v5 = vmul.f32 0.7978846, %v1239_v4 }
 0xa23   : > { %3332 = vtanh.f32 %v1240_v5 }
 0xa2d   : > { %v3333_v6 = vpop.eup %3332 }
 0xa2e   : > { %v1242_v8 = vadd.f32 1.0, %v3333_v6 }
 0xa30   : > { %v1243_v9 = vmul.f32 %v1242_v8, %v1235_v7 }
 0xa32   : > { %v1244_v10 = vpack.c.bf16 %v1243_v9, %v1243_v9 }
 0xa34   : > { %3098 = vmatmul.mubr.bf16.vlgmr.msra.gmra.mrb[12].mxu1 %v1244_v10 }
 0xa35   : > { %3141 = vmatprep.mubr.msk.f32.mxu1 %vm3499_vm0, %v3498_v0 }
 0xb07   : > { %v1331_v12 = vpop.f32.mrb[12].mxu1 }
 0xb08   : > { %v1332_v13 = vadd.f32 %v2880_v11, %v1331_v12  ;;  %v3099_v14 = vpop.f32.mrb[13].mxu1 }
 0xb09   : > { %v1334_v15 = vpop.f32.mrb[14].mxu1 }
 0xb0a   : > { %v3100_v16 = vpop.f32.mrb[15].mxu1  ;;  %v1337_v17 = vadd.f32 %v1332_v13, %v1174_v48 }
 0xb0c   : > { %v1338_v18 = vsel %vm365_vm1, %v1337_v17, 0.0 }
 0xb0d   : > { %1339 = vadd.xlane.f32.xlu1 %v1338_v18 }
 0xb9a   : > { %v1340_v19 = vpop.xlane.xlu1 %1339 }
 0xb9b   : > { %v1341_v20 = vmul.f32 0.03125, %v1340_v19 }
 0xb9d   : > { %v1342_v21 = vsub.f32 %v1337_v17, %v1341_v20 }
 0xb9f   : > { %v1343_v22 = vmul.f32 %v1342_v21, %v1342_v21 }
 0xba1   : > { %v1344_v23 = vsel %vm365_vm1, %v1343_v22, 0.0 }
 0xba2   : > { %1345 = vadd.xlane.f32.xlu1 %v1344_v23 }
 0xbb3   : > { %1351 = vrot.lane.b32.xlu1 %v3798_v33, %s3500_s21 }
 0xc2f   : > { %v1346_v26 = vpop.xlane.xlu1 %1345 }
 0xc30   : > { %v1347_v27 = vmul.f32 0.03125, %v1346_v26 }
 0xc32   : > { %v1348_v28 = vadd.f32 1e-05, %v1347_v27 }
 0xc33   : > { %v1352_v30 = vpop.permute.xlu1 %1351 }
 0xc34   : > { %3334 = vrsqrt.f32 %v1348_v28 }
 0xc3e   : > { %v3335_v29 = vpop.eup %3334 }
 0xc3f   : > { %v1350_v31 = vmul.f32 %v3335_v29, %v1342_v21 }
 0xc41   : > { %v1354_v34 = vmul.f32 %v1352_v30, %v1350_v31 }
 0xc43   : > { %v3833_v35 = vadd.f32 %v1356_v32, %v1354_v34 }
 0xc45   : > { %v1394_v33 = vpack.c.bf16 %v3833_v35, %v3833_v35 }
 0xc47   : > { %3106 = vmatmul.mubr.msk.bf16.vlgmr.msra.gmra.mrb[20].mxu0 %vm365_vm1, %v1394_v33 }
 0xc48   : > { %3111 = vmatprep.mubr.msk.f32.mxu0 %vm3499_vm0, %v3498_v0 }
 0xd1a   : > { %v1448_v37 = vpop.f32.mrb[20].mxu0 }
 0xd1b   : > { %v3843_v38 = vadd.f32 %v2894_v36, %v1448_v37  ;;  %v3107_v39 = vpop.f32.mrb[21].mxu0 }
 0xd1c   : > { %v1451_v3 = vpop.f32.mrb[22].mxu0 }
 0xd1d   : > { %1455 = vrot.lane.b32.xlu0 %v3843_v38, %s3501_s22  ;;  %v3108_v40 = vpop.f32.mrb[23].mxu0 }
 0xd8f   : > { %v1456_v41 = vpop.permute.xlu0 %1455 }
 0xd90   : > { %3110 = vmatpush3.xpose.msk.msra.mxu0 %vm412_vm2, %v1456_v41 }
 0xd91   : > { %3114 = vmatprep.subr.mxu0 %v3498_v0 }
 0xd93   : > { %3112 = vmatmul.mubr.msk.f32.vlgmr.msra.gmra.mrb[10].mxu0 %vm412_vm2, %v3843_v38 }
 0xd94   : > { %3116 = vmatprep.mubr.msk.f32.mxu0 %vm3499_vm0, %v3498_v0 }
 0xe66   : > { %v1527_v42 = vpop.f32.mrb[10].mxu0 }
 0xe67   : > { %v1531_v43 = vmul.f32 0.35355338, %v1527_v42  ;;  %v3113_v44 = vpop.f32.mrb[11].mxu0 }
 0xe69   : > { %v1532_v45 = vsel %vm412_vm2, %v1531_v43, -inf }
 0xe6a   : > { %1533 = vmax.xlane.f32.xlu0 %v1532_v45 }
 0xe80   : > { %1543 = vrot.lane.b32.xlu0 %v3843_v38, %s3500_s21 }
 0xe84   : > { %1619 = vrot.lane.b32.xlu0 %v3843_v38, %s3503_s26 }
 0xef7   : > { %v1534_v46 = vpop.xlane.xlu0 %1533 }
 0xef8   : > { %v1535_v47 = vsub.f32 %v1531_v43, %v1534_v46  ;;  %v3301_v43 = vld [vmem:[#allocation6 + $0x88] sm:$0xff]  }
 0xefa   : > { %v1536_v48 = vmul.f32 1.442695, %v1535_v47 }
 0xefb   : > { %v1544_v49 = vpop.permute.xlu0 %1543 }
 0xefc   : > { %3336 = vpow2.f32 %v1536_v48  ;;  %3115 = vmatpush3.msra.mxu0 %v1544_v49 }
 0xefd   : > { %3119 = vmatprep.subr.mxu0 %v3498_v0 }
 0xeff   : > { %v1620_v56 = vpop.permute.xlu0 %1619 }
 0xf06   : > { %v3337_v50 = vpop.eup %3336 }
 0xf07   : > { %v1538_v51 = vsel %vm412_vm2, %v3337_v50, 0.0 }
 0xf08   : > { %1539 = vadd.xlane.f32.xlu1 %v1538_v51 }
 0xf19   : > { %1621 = vrot.lane.b32.xlu1 %v3843_v38, %s3502_s23 }
 0xf95   : > { %v1540_v52 = vpop.xlane.xlu1 %1539 }
 0xf96   : > { %3338 = vrcp.f32 %v1540_v52 }
 0xf99   : > { %v1622_v55 = vpop.permute.xlu1 %1621 }
 0xfa0   : > { %v3339_v53 = vpop.eup %3338 }
 0xfa1   : > { %v1542_v54 = vmul.f32 %v3339_v53, %v3337_v50 }
 0xfa3   : > { %3117 = vmatmul.mubr.msk.f32.vlgmr.msra.gmra.mrb[24].mxu0 %vm412_vm2, %v1542_v54 }
 0xfa4   : > { %3120 = vmatpush3.xpose.msk.msra.mxu0 %vm412_vm2, %v1622_v55  ;;  %3121 = vmatprep.mubr.msk.f32.mxu0 %vm3499_vm0, %v3498_v0  ;;  %v2910_v55 = vld [vmem:[%s4030_s4 + $0x9] ss:$0 sm:$0xff] }
 0xfa5   : > { %3124 = vmatprep.subr.mxu0 %v3498_v0 }
 0xfa7   : > { %3122 = vmatmul.mubr.msk.f32.vlgmr.msra.gmra.mrb[26].mxu0 %vm412_vm2, %v1620_v56 }
 0xfa8   : > { %3126 = vmatprep.mubr.msk.f32.mxu0 %vm3499_vm0, %v3498_v0 }
0x1076   : > { %v3870_v57 = vpop.f32.mrb[24].mxu0 }
0x1077   : > { %v3118_v58 = vpop.f32.mrb[25].mxu0 }
0x107a   : > { %v1693_v59 = vpop.f32.mrb[26].mxu0 }
0x107b   : > { %v1697_v60 = vmul.f32 0.35355338, %v1693_v59  ;;  %v3123_v61 = vpop.f32.mrb[27].mxu0 }
0x107d   : > { %v1698_v62 = vsel %vm412_vm2, %v1697_v60, -inf }
0x107e   : > { %1699 = vmax.xlane.f32.xlu1 %v1698_v62 }
0x108f   : > { %1787 = vrot.lane.b32.xlu1 %v3843_v38, %s3504_s27 }
0x1093   : > { %1785 = vrot.lane.b32.xlu1 %v3843_v38, %s3506_s8 }
0x1097   : > { %1951 = vrot.lane.b32.xlu1 %v3843_v38, %s3507_s11 }
0x110b   : > { %v1700_v63 = vpop.xlane.xlu1 %1699 }
0x110c   : > { %v1701_v1 = vsub.f32 %v1697_v60, %v1700_v63 }
0x110e   : > { %v1702_v2 = vmul.f32 1.442695, %v1701_v1 }
0x110f   : > { %v1788_v6 = vpop.permute.xlu1 %1787 }
0x1110   : > { %3340 = vpow2.f32 %v1702_v2 }
0x1113   : > { %v1786_v9 = vpop.permute.xlu1 %1785 }
0x1117   : > { %v1952_v12 = vpop.permute.xlu1 %1951 }
0x111a   : > { %v3341_v4 = vpop.eup %3340 }
0x111b   : > { %v1704_v5 = vsel %vm412_vm2, %v3341_v4, 0.0 }
0x111c   : > { %1705 = vadd.xlane.f32.xlu0 %v1704_v5 }
0x1132   : > { %1709 = vrot.lane.b32.xlu0 %v3843_v38, %s3508_s24 }
0x1136   : > { %1953 = vrot.lane.b32.xlu0 %v3843_v38, %s3505_s28 }
0x11a9   : > { %v1706_v7 = vpop.xlane.xlu0 %1705 }
0x11aa   : > { %3342 = vrcp.f32 %v1706_v7  ;;  %v3935_v7 = vld [vmem:[%s4030_s4 + $0xa] ss:$0 sm:$0xff] }
0x11ad   : > { %v1710_v8 = vpop.permute.xlu0 %1709 }
0x11ae   : > { %3125 = vmatpush3.msra.mxu0 %v1710_v8  ;;  %v3304_v8 = vld [vmem:[#allocation6 + $0xa0] sm:$0xff]  }
0x11af   : > { %3129 = vmatprep.subr.mxu0 %v3498_v0 }
0x11b1   : > { %v1954_v10 = vpop.permute.xlu0 %1953 }
0x11b2   : > { %3140 = vmatpush3.xpose.msk.msra.mxu1 %vm412_vm2, %v1954_v10 }
0x11b3   : > { %3149 = vmatprep.subr.bf16.mxu1 %v3498_v0 }
0x11b4   : > { %v3343_v11 = vpop.eup %3342 }
0x11b5   : > { %v1708_v13 = vmul.f32 %v3343_v11, %v3341_v4  ;;  %3142 = vmatmul.mubr.msk.f32.vlgmr.msra.gmra.mrb[10].mxu1 %vm412_vm2, %v1952_v12 }
0x11b6   : > { %3153 = vmatprep.mubr.msk.bf16.mxu1 %vm3499_vm0, %v3498_v0 }
0x11b7   : > { %3127 = vmatmul.mubr.msk.f32.vlgmr.msra.gmra.mrb[28].mxu0 %vm412_vm2, %v1708_v13 }
0x11b8   : > { %3130 = vmatpush3.xpose.msk.msra.mxu0 %vm412_vm2, %v1788_v6  ;;  %3131 = vmatprep.mubr.msk.f32.mxu0 %vm3499_vm0, %v3498_v0  ;;  %v3302_v6 = vld [vmem:[#allocation6 + $0x90] sm:$0xff]  }
0x11b9   : > { %3134 = vmatprep.subr.mxu0 %v3498_v0 }
0x11bb   : > { %3132 = vmatmul.mubr.msk.f32.vlgmr.msra.gmra.mrb[30].mxu0 %vm412_vm2, %v1786_v9 }
0x11bc   : > { %3136 = vmatprep.mubr.msk.f32.mxu0 %vm3499_vm0, %v3498_v0 }
0x1288   : > { %v2025_v14 = vpop.f32.mrb[10].mxu1 }
0x1289   : > { %v2029_v15 = vmul.f32 0.35355338, %v2025_v14  ;;  %v3143_v16 = vpop.f32.mrb[11].mxu1 }
0x128a   : > { %v1781_v17 = vpop.f32.mrb[28].mxu0 }
0x128b   : > { %v3128_v18 = vpop.f32.mrb[29].mxu0  ;;  %v2030_v19 = vsel %vm412_vm2, %v2029_v15, -inf }
0x128c   : > { %2031 = vmax.xlane.f32.xlu1 %v2030_v19  ;;  %v3305_v18 = vld [vmem:[#allocation6 + $0xa8] sm:$0xff]   ;;  %v3306_v19 = vld [vmem:[#allocation6 + $0xb0] sm:$0xff]  }
0x128e   : > { %v1859_v20 = vpop.f32.mrb[30].mxu0 }
0x128f   : > { %v1863_v21 = vmul.f32 0.35355338, %v1859_v20  ;;  %v3133_v22 = vpop.f32.mrb[31].mxu0  ;;  %v3307_v20 = vld [vmem:[#allocation6 + $0xb8] sm:$0xff]  }
0x1290   : > { %v3309_v22 = vld [vmem:[#allocation6 + $0xc8] sm:$0xff]  }
0x1291   : > { %v1864_v23 = vsel %vm412_vm2, %v1863_v21, -inf }
0x1292   : > { %1865 = vmax.xlane.f32.xlu0 %v1864_v23  ;;  %v3310_v23 = vld [vmem:[#allocation6 + $0xd0] sm:$0xff]  }
0x129d   : > { %1875 = vrot.lane.b32.xlu1 %v3843_v38, %s3510_s10 }
0x12a1   : > { %2118 = vrot.lane.b32.xlu1 %v1781_v17, %s3511_s13  ;;  %s309_s13 = scalar_lea.vmem %s4028_s2, %s2853_s12  ;;  %s3979_s12 = sld [smem:[#allocation5 + %s3567_s0]] }
0x1319   : > { %v2032_v24 = vpop.xlane.xlu1 %2031 }
0x131a   : > { %v2033_v25 = vsub.f32 %v2029_v15, %v2032_v24  ;;  %v3311_v24 = vld [vmem:[#allocation6 + $0xd8] sm:$0xff]  }
0x131c   : > { %v2034_v26 = vmul.f32 1.442695, %v2033_v25  ;;  %v2915_v25 = vld [vmem:[%s4030_s4 + $0xb] ss:$0 sm:$0xff] }
0x131d   : > { %v1876_v27 = vpop.permute.xlu1 %1875 }
0x131e   : > { %3344 = vpow2.f32 %v2034_v26  ;;  %3135 = vmatpush3.msra.mxu0 %v1876_v27 }
0x131f   : > { %v1866_v28 = vpop.xlane.xlu0 %1865  ;;  %3144 = vmatprep.subr.mxu0 %v3498_v0 }
0x1320   : > { %v1867_v29 = vsub.f32 %v1863_v21, %v1866_v28  ;;  %v3308_v21 = vld [vmem:[#allocation6 + $0xc0] sm:$0xff]  }
0x1321   : > { %v2119_v48 = vpop.permute.xlu1 %2118 }
0x1322   : > { %v1868_v30 = vmul.f32 1.442695, %v1867_v29  ;;  %v2129_v50 = vsel %vm412_vm2, %v3870_v57, %v2119_v48 }
0x1324   : > { %3346 = vpow2.f32 %v1868_v30 }
0x1328   : > { %v3345_v31 = vpop.eup %3344 }
0x1329   : > { %v2036_v32 = vsel %vm412_vm2, %v3345_v31, 0.0 }
0x132a   : > { %2037 = vadd.xlane.f32.xlu0 %v2036_v32 }
0x132e   : > { %v3347_v34 = vpop.eup %3346 }
0x132f   : > { %v1870_v33 = vsel %vm412_vm2, %v3347_v34, 0.0 }
0x1330   : > { %1871 = vadd.xlane.f32.xlu0 %v1870_v33 }
0x1346   : > { %2041 = vrot.lane.b32.xlu0 %v3843_v38, %s3509_s25  ;;  %v3300_v38 = vld [vmem:[#allocation6 + $0x80] sm:$0xff]  }
0x1347   : > { %3150 = vmatpush3.bf16.msra.mxu1 %v3300_v38 }
0x1348   : > { %3151 = vmatprep.subr.bf16.mxu1 %v3498_v0 }
0x134b   : > { %3152 = vmatpush3.bf16.msra.mxu1 %v3301_v43 }
0x134c   : > { %3165 = vmatprep.subr.bf16.mxu1 %v3498_v0 }
0x13b7   : > { %v2038_v36 = vpop.xlane.xlu0 %2037 }
0x13bd   : > { %v1872_v37 = vpop.xlane.xlu0 %1871 }
0x13be   : > { %3348 = vrcp.f32 %v1872_v37 }
0x13bf   : > { %3350 = vrcp.f32 %v2038_v36 }
0x13c1   : > { %v2042_v41 = vpop.permute.xlu0 %2041 }
0x13c8   : > { %v3349_v39 = vpop.eup %3348 }
0x13c9   : > { %v1874_v3 = vmul.f32 %v3349_v39, %v3347_v34  ;;  %v3351_v40 = vpop.eup %3350 }
0x13ca   : > { %v2040_v42 = vmul.f32 %v3351_v40, %v3345_v31 }
0x13cb   : > { %3137 = vmatmul.mubr.msk.f32.vlgmr.msra.gmra.mrb[32].mxu0 %vm412_vm2, %v1874_v3 }
0x13cc   : > { %3145 = vmatpush3.msra.mxu0 %v2042_v41  ;;  %3146 = vmatprep.mubr.msk.f32.mxu0 %vm3499_vm0, %v3498_v0 }
0x13cd   : > { %3157 = vmatprep.subr.bf16.mxu0 %v3498_v0 }
0x13cf   : > { %3147 = vmatmul.mubr.msk.f32.vlgmr.msra.gmra.mrb[34].mxu0 %vm412_vm2, %v2040_v42  ;;  %v2919_v42 = vld [vmem:[%s4030_s4 + $0xc] ss:$0 sm:$0xff] }
0x13d0   : > { %3161 = vmatprep.mubr.msk.bf16.mxu0 %vm3499_vm0, %v3498_v0  ;;  %3158 = vmatpush3.bf16.msra.mxu0 %v3302_v6 }
0x13d1   : > { %3159 = vmatprep.subr.bf16.mxu0 %v3498_v0 }
0x149e   : > { %v1947_v44 = vpop.f32.mrb[32].mxu0 }
0x149f   : > { %2122 = vrot.lane.b32.xlu1 %v1947_v44, %s3512_s14  ;;  %v3138_v45 = vpop.f32.mrb[33].mxu0 }
0x14a2   : > { %v2113_v46 = vpop.f32.mrb[34].mxu0 }
0x14a3   : > { %2126 = vrot.lane.b32.xlu0 %v2113_v46, %s3513_s20  ;;  %v3148_v47 = vpop.f32.mrb[35].mxu0 }
0x1511   : > { %v2123_v49 = vpop.permute.xlu1 %2122 }
0x1512   : > { %v2130_v51 = vsel %vm1086_vm3, %v2129_v50, %v2123_v49  ;;  %v3515_v49 = vmov 0   ;;  %v2469_v50 = vld [vmem:[%s309_s13] sm:$0xff] }
0x1513   : > { %3283 = vset.pattern.permute.xlu0 %v3515_v49 }
0x1515   : > { %v2127_v52 = vpop.permute.xlu0 %2126 }
0x1516   : > { %v2131_v53 = vsel %vm1088_vm4, %v2130_v51, %v2127_v52 }
0x1517   : > { %v2132_v54 = vpack.c.bf16 %v2131_v53, %v2131_v53 }
0x1519   : > { %3154 = vmatmul.mubr.msk.bf16.vlgmr.msra.gmra.mrb[16].mxu1 %vm365_vm1, %v2132_v54 }
0x151a   : > { %3181 = vmatprep.mubr.msk.bf16.mxu1 %vm3499_vm0, %v3498_v0  ;;  %3166 = vmatpush3.bf16.msra.mxu1 %v3304_v8 }
0x151b   : > { %3167 = vmatprep.subr.bf16.mxu1 %v3498_v0 }
0x151e   : > { %3168 = vmatpush3.bf16.msra.mxu1 %v3305_v18 }
0x151f   : > { %3169 = vmatprep.subr.bf16.mxu1 %v3498_v0 }
0x1522   : > { %3170 = vmatpush3.bf16.msra.mxu1 %v3306_v19 }
0x1523   : > { %3171 = vmatprep.subr.bf16.mxu1 %v3498_v0 }
0x1526   : > { %3172 = vmatpush3.bf16.msra.mxu1 %v3307_v20  ;;  %v2928_v20 = vld [vmem:[#allocation10 + $0xa] ss:$0 sm:$0xff] }
0x1527   : > { %3173 = vmatprep.subr.bf16.mxu1 %v3498_v0 }
0x152a   : > { %3174 = vmatpush3.bf16.msra.mxu1 %v3308_v21 }
0x152b   : > { %3175 = vmatprep.subr.bf16.mxu1 %v3498_v0 }
0x152e   : > { %3176 = vmatpush3.bf16.msra.mxu1 %v3309_v22 }
0x152f   : > { %3177 = vmatprep.subr.bf16.mxu1 %v3498_v0 }
0x1532   : > { %3178 = vmatpush3.bf16.msra.mxu1 %v3310_v23 }
0x1533   : > { %3179 = vmatprep.subr.bf16.mxu1 %v3498_v0 }
0x1536   : > { %3180 = vmatpush3.bf16.msra.mxu1 %v3311_v24 }
0x15ec   : > { %v2186_v56 = vpop.f32.mrb[16].mxu1 }
0x15ed   : > { %v2187_v58 = vadd.f32 %v2910_v55, %v2186_v56  ;;  %v3155_v59 = vpop.f32.mrb[17].mxu1  ;;  %v3312_v56 = vld [vmem:[#allocation8] sm:$0xff]  }
0x15ee   : > { %v2189_v60 = vpop.f32.mrb[18].mxu1  ;;  %v2466_v59 = vld [vmem:[#allocation10] sm:$0xff] }
0x15ef   : > { %v3156_v57 = vpop.f32.mrb[19].mxu1  ;;  %v2192_v61 = vadd.f32 %v2187_v58, %v3833_v35  ;;  %v3303_v35 = vld [vmem:[#allocation6 + $0x98] sm:$0xff]   ;;  %v3313_v58 = vld [vmem:[#allocation8 + $0x8] sm:$0xff]   ;;  %v2627_v60 = vmul.f32 1.442695, %v2466_v59 }
0x15f0   : > { %3160 = vmatpush3.bf16.msra.mxu0 %v3303_v35  ;;  %v2471_v35 = vlaneseq }
0x15f1   : > { %v2193_v62 = vsel %vm365_vm1, %v2192_v61, 0.0  ;;  %3185 = vmatprep.subr.bf16.mxu0 %v3498_v0 }
0x15f2   : > { %2194 = vadd.xlane.f32.xlu1 %v2193_v62 }
0x167f   : > { %v2195_v63 = vpop.xlane.xlu1 %2194 }
0x1680   : > { %v2196_v1 = vmul.f32 0.03125, %v2195_v63 }
0x1682   : > { %v2197_v2 = vsub.f32 %v2192_v61, %v2196_v1 }
0x1684   : > { %v2198_v4 = vmul.f32 %v2197_v2, %v2197_v2 }
0x1686   : > { %v2199_v5 = vsel %vm365_vm1, %v2198_v4, 0.0 }
0x1687   : > { %2200 = vadd.xlane.f32.xlu0 %v2199_v5 }
0x169d   : > { %2212 = vrot.lane.b32.xlu0 %v3935_v7, %s3501_s22 }
0x16a1   : > { %2396 = vrot.lane.b32.xlu0 %v3935_v7, %s3514_s18 }
0x16a5   : > { %2474 = vperm.xlu0 %3283, %v2469_v50  }
0x1714   : > { %v2201_v9 = vpop.xlane.xlu0 %2200 }
0x1715   : > { %v2202_v10 = vmul.f32 0.03125, %v2201_v9  ;;  %v2472_v9 = vand.u32 127, %v2471_v35 }
0x1717   : > { %v2203_v11 = vadd.f32 1e-05, %v2202_v10 }
0x1718   : > { %v2213_v14 = vpop.permute.xlu0 %2212 }
0x1719   : > { %3352 = vrsqrt.f32 %v2203_v11 }
0x171c   : > { %v2397_v6 = vpop.permute.xlu0 %2396 }
0x1723   : > { %v3353_v12 = vpop.eup %3352 }
0x1724   : > { %v2205_v13 = vmul.f32 %v3353_v12, %v2197_v2  ;;  %v2475_v10 = vpop.permute.xlu0 %2474  ;;  %v2480_v12 = vshrl.u32 %v2471_v35, 7 }
0x1725   : > { %vm2476_vm5 = vcmp.eq.s32.totalorder %v2472_v9, %v2475_v10 }
0x1726   : > { %v2210_v15 = vmul.f32 %v3935_v7, %v2205_v13  ;;  %v2932_v11 = vsel %vm2476_vm5, 1.0, %v3498_v0 }
0x1728   : > { %v2215_v16 = vadd.f32 %v2213_v14, %v2210_v15 }
0x172a   : > { %v2216_v17 = vpack.c.bf16 %v2215_v16, %v2215_v16 }
0x172c   : > { %3162 = vmatmul.mubr.msk.bf16.vlgmr.msra.gmra.mrb[36].mxu0 %vm365_vm1, %v2216_v17 }
0x172d   : > { %3189 = vmatprep.mubr.msk.bf16.mxu0 %vm3499_vm0, %v3498_v0  ;;  %3186 = vmatpush3.bf16.msra.mxu0 %v3312_v56 }
0x172e   : > { %3187 = vmatprep.subr.bf16.mxu0 %v3498_v0 }
0x1731   : > { %3188 = vmatpush3.bf16.msra.mxu0 %v3313_v58 }
0x1732   : > { %3193 = vmatprep.subr.mxu0 %v3498_v0 }
0x17ff   : > { %v2270_v26 = vpop.f32.mrb[36].mxu0 }
0x1800   : > { %v2271_v27 = vadd.f32 %v2915_v25, %v2270_v26  ;;  %v3163_v28 = vpop.f32.mrb[37].mxu0  ;;  %v2467_v25 = vld [vmem:[#allocation10 + $0x8] sm:$0x1] }
0x1801   : > { %v2273_v29 = vpop.f32.mrb[38].mxu0 }
0x1802   : > { %v2277_v30 = vmul.f32 0.044715, %v2271_v27  ;;  %v3164_v31 = vpop.f32.mrb[39].mxu0  ;;  %v2276_v39 = vmul.f32 0.5, %v2271_v27 }
0x1804   : > { %v2278_v32 = vmul.f32 %v2277_v30, %v2271_v27  ;;  %v2580_v30 = vmul.f32 %v2932_v11, %v2467_v25 }
0x1806   : > { %v2279_v34 = vmul.f32 %v2278_v32, %v2271_v27  ;;  %v3986_v32 = vld [vmem:[#allocation10 + $0x9] sm:$0x1] }
0x1808   : > { %v2280_v33 = vadd.f32 %v2279_v34, %v2271_v27  ;;  %v2561_v34 = vrot.slane %v2932_v11, 1 }
0x180a   : > { %v2281_v36 = vmul.f32 0.7978846, %v2280_v33 }
0x180c   : > { %3354 = vtanh.f32 %v2281_v36  ;;  %v2582_v36 = vsel %vm2581_vm7, %v2580_v30, 0.0 }
0x180d   : > { %3356 = vpow2.f32 %v2627_v60 }
0x1816   : > { %v3355_v37 = vpop.eup %3354 }
0x1817   : > { %v2283_v3 = vadd.f32 1.0, %v3355_v37  ;;  %v3971_v57 = vpop.eup %3356 }
0x1819   : > { %v2284_v40 = vmul.f32 %v2283_v3, %v2276_v39 }
0x181b   : > { %v2285_v41 = vpack.c.bf16 %v2284_v40, %v2284_v40 }
0x181d   : > { %3182 = vmatmul.mubr.bf16.vlgmr.msra.gmra.mrb[20].mxu1 %v2285_v41 }
0x18f0   : > { %v2372_v38 = vpop.f32.mrb[20].mxu1 }
0x18f1   : > { %v2373_v43 = vadd.f32 %v2919_v42, %v2372_v38  ;;  %v3183_v44 = vpop.f32.mrb[21].mxu1  ;;  %v2481_v42 = vstv %s3979_s12 }
0x18f2   : > { %v2375_v45 = vpop.f32.mrb[22].mxu1  ;;  %vm2482_vm9 = vcmp.lt.s32.totalorder %v2480_v12, %v2481_v42 }
0x18f3   : > { %v3184_v46 = vpop.f32.mrb[23].mxu1  ;;  %v2378_v47 = vadd.f32 %v2373_v43, %v2215_v16  ;;  %v2933_v43 = vsel %vm2482_vm9, 1.0, %v3498_v0 }
0x18f5   : > { %v2379_v48 = vsel %vm365_vm1, %v2378_v47, 0.0 }
0x18f6   : > { %2380 = vadd.xlane.f32.xlu1 %v2379_v48 }
0x1983   : > { %v2381_v51 = vpop.xlane.xlu1 %2380 }
0x1984   : > { %v2382_v52 = vmul.f32 0.03125, %v2381_v51 }
0x1986   : > { %v2383_v53 = vsub.f32 %v2378_v47, %v2382_v52  ;;  %v2600_v47 = vrot.slane %v2933_v43, 1 }
0x1988   : > { %v2384_v54 = vmul.f32 %v2383_v53, %v2383_v53 }
0x198a   : > { %v2385_v55 = vsel %vm365_vm1, %v2384_v54, 0.0 }
0x198b   : > { %2386 = vadd.xlane.f32.xlu1 %v2385_v55 }
0x199c   : > { %2392 = vrot.lane.b32.xlu1 %v3935_v7, %s3500_s21  ;;  %s3982_s21 = sadd.s32 4294967295, %s3979_s12 }
0x199d   : > { %v2569_v13 = vstv %s3982_s21  ;;  %p2937_p7 = scmp.le.s32.totalorder %s3982_s21, 0 }
0x199e   : > { %vm2570_vm6 = vcmp.eq.s32.totalorder %v2480_v12, %v2569_v13  ;;  %s4000_s16 = smov (!%p2937_p7), 0  }
0x199f   : > { %v2936_v14 = vsel %vm2570_vm6, 1.0, %v3498_v0 }
0x19a0   : > { %v2573_v15 = vmul.f32 %v2936_v14, %v2932_v11 }
0x19a2   : > { %v2574_v16 = vrot.slane %v2573_v15, 4 }
0x19a4   : > { %v2575_v17 = vadd.f32 %v2574_v16, %v2573_v15 }
0x19a6   : > { %v2576_v18 = vrot.slane %v2575_v17, 2 }
0x19a8   : > { %v2577_v19 = vadd.f32 %v2576_v18, %v2575_v17 }
0x19aa   : > { %v2578_v22 = vrot.slane %v2577_v19, 1 }
0x19ac   : > { %v2579_v31 = vadd.f32 %v2578_v22, %v2577_v19 }
0x19ae   : > { %v2615_v37 = vmul.f32 %v2579_v31, %v3986_v32 }
0x19b0   : > { %v2616_v41 = vsel %vm2581_vm7, %v2615_v37, 0.0 }
0x1a18   : > { %v2387_v61 = vpop.xlane.xlu1 %2386 }
0x1a19   : > { %v2388_v62 = vmul.f32 0.03125, %v2387_v61 }
0x1a1b   : > { %v2389_v63 = vadd.f32 1e-05, %v2388_v62 }
0x1a1c   : > { %v2393_v2 = vpop.permute.xlu1 %2392 }
0x1a1d   : > { %3358 = vrsqrt.f32 %v2389_v63 }
0x1a27   : > { %v3359_v1 = vpop.eup %3358 }
0x1a28   : > { %v2391_v4 = vmul.f32 %v3359_v1, %v2383_v53 }
0x1a2a   : > { %v2395_v5 = vmul.f32 %v2393_v2, %v2391_v4 }
0x1a2c   : > { %v2399_v7 = vadd.f32 %v2397_v6, %v2395_v5 }
0x1a2e   : > { %v2401_v8 = vpack.c.bf16 %v2399_v7, %v2399_v7 }
0x1a30   : > { %3190 = vmatmul.mubr.msk.bf16.vlgmr.msra.gmra.mrb[40].mxu0 %vm365_vm1, %v2401_v8 }
0x1a31   : > { %3194 = vmatpush3.msra.mxu0 %v2466_v59  ;;  %3195 = vmatprep.mubr.msk.f32.mxu0 %vm3499_vm0, %v3498_v0 }
0x1a38   : > { %3196 = vmatmul.mubr.msk.f32.vlgmr.msra.gmra.mrb[44].mxu0 %vm412_vm2, %v2932_v11 }
0x1b03   : > { %v2459_v21 = vpop.f32.mrb[40].mxu0 }
0x1b04   : > { %v2460_v23 = vadd.f32 %v2928_v20, %v2459_v21  ;;  %v3191_v24 = vpop.f32.mrb[41].mxu0 }
0x1b05   : > { %v2462_v26 = vpop.f32.mrb[42].mxu0 }
0x1b06   : > { %2465 = vst [vmem:[#allocation2] sm:$0xff] %v2460_v23  ;;  %v3192_v27 = vpop.f32.mrb[43].mxu0  ;;  %v2485_v28 = vmul.f32 %v2932_v11, %v2460_v23  ;;  %v2629_v29 = vadd.f32 %v2467_v25, %v2460_v23 }
0x1b08   : > { %2486 = vadd.xlane.f32.xlu1 %v2485_v28  ;;  %2630 = vst [vmem:[#allocation3] sm:$0x1] %v2629_v29 }
0x1b0b   : > { %v2557_v33 = vpop.f32.mrb[44].mxu0 }
0x1b0c   : > { %v2563_v39 = vmul.f32 %v2561_v34, %v2557_v33  ;;  %2583 = vadd.xlane.f32.xlu1 %v2582_v36  ;;  %v3197_v3 = vpop.f32.mrb[45].mxu0 }
0x1b0e   : > { %v2565_v40 = vsel %vm2564_vm8, %v2563_v39, 0.0 }
0x1b0f   : > { %2566 = vadd.xlane.f32.xlu0 %v2565_v40 }
0x1b10   : > { %2617 = vadd.xlane.f32.xlu1 %v2616_v41 }
0x1b95   : > { %v2487_v38 = vpop.xlane.xlu1 %2486 }
0x1b96   : > { %v2596_v46 = vrot.slane %v2487_v38, 1 }
0x1b99   : > { %v2584_v44 = vpop.xlane.xlu1 %2583 }
0x1b9a   : > { %v2585_v45 = vrot.slane %v2584_v44, 4 }
0x1b9c   : > { %v2586_v48 = vadd.f32 %v2585_v45, %v2584_v44  ;;  %v2567_v49 = vpop.xlane.xlu0 %2566 }
0x1b9d   : > { %v2598_v50 = vadd.f32 %v2596_v46, %v2567_v49  ;;  %v2618_v58 = vpop.xlane.xlu1 %2617 }
0x1b9e   : > { %v2587_v51 = vrot.slane %v2586_v48, 2  ;;  %v2619_v59 = vrot.slane %v2618_v58, 4 }
0x1b9f   : > { %v2602_v52 = vmul.f32 %v2600_v47, %v2598_v50 }
0x1ba0   : > { %v2588_v53 = vadd.f32 %v2587_v51, %v2586_v48  ;;  %v2620_v0 = vadd.f32 %v2619_v59, %v2618_v58 }
0x1ba1   : > { %v2604_v54 = vsel %vm2603_vm10, %v2602_v52, 0.0 }
0x1ba2   : > { %2605 = vadd.xlane.f32.xlu0 %v2604_v54  ;;  %v2589_v55 = vrot.slane %v2588_v53, 1  ;;  %v2621_v60 = vrot.slane %v2620_v0, 2 }
0x1ba4   : > { %v2590_v56 = vadd.f32 %v2589_v55, %v2588_v53  ;;  %v2622_v1 = vadd.f32 %v2621_v60, %v2620_v0 }
0x1ba6   : > { %3203 = vpush %v2590_v56  ;;  %v2623_v5 = vrot.slane %v2622_v1, 1 }
0x1ba7   : > { %3205 = vpush %v2487_v38 }
0x1ba8   : > { %v2624_v35 = vadd.f32 %v2623_v5, %v2622_v1 }
0x1bd7   : > { %s3204_s0 = spop %3203 }
0x1bd8   : > { %s3206_s14 = spop %3205 }
0x1bd9   : > { %s2594_s20 = sadd.f32 %s3206_s14, %s3204_s0 }
0x1c2f   : > { %v2606_v61 = vpop.xlane.xlu0 %2605 }
0x1c30   : > { %v2607_v62 = vrot.slane %v2606_v61, 4 }
0x1c32   : > { %v2608_v63 = vadd.f32 %v2607_v62, %v2606_v61 }
0x1c34   : > { %v2609_v2 = vrot.slane %v2608_v63, 2 }
0x1c36   : > { %v2610_v4 = vadd.f32 %v2609_v2, %v2608_v63 }
0x1c38   : > { %v2611_v6 = vrot.slane %v2610_v4, 1 }
0x1c3a   : > { %v2612_v7 = vadd.f32 %v2611_v6, %v2610_v4 }
0x1c3c   : > { %3207 = vpush %v2612_v7 }
0x1c3d   : > { %3209 = vpush %v2624_v35 }
0x1c6a   : > { %2786 = sbr.rel (%p2937_p7) target bundleno = 7672 (0x1df8), region = 94 }
0x1c6d   : > { %s3208_s17 = spop %3207 }
0x1c6e   : > { %s3993_s9 = sadd.f32 %s3208_s17, %s2594_s20  ;;  %s3995_s18 = spop %3209 }
0x1c70   : > { %s2626_s19 = sadd.f32 %s3995_s18, %s3993_s9 }
0x1c71 LB: >> { %v2638_v8 = vld [vmem:[#allocation3] sm:$0x1]  ;;  %vm2639_vm11 = vcmask 57344   ;;  %v3516_v10 = vmov 0.0   ;;  %vm3517_vm12 = vmmov 0   ;;  %s2780_s23 = scalar_lea.vmem [#allocation2], %s3488_s16  ;;  %s3488_s16 = sphi %s4000_s16, %s2634_s16  }
0x1c72   : >> { %v2640_v9 = vsel %vm2639_vm11, %v2638_v8, -inf  ;;  %3198 = vmatprep.subr.mxu0 %v3516_v10  ;;  %3200 = vmatprep.mubr.msk.f32.mxu0 %vm3517_vm12, %v3516_v10  ;;  %v2939_v20 = vld [vmem:[%s2780_s23 + $0x1] sm:$0x1]  ;;  %s2634_s16 = sadd.s32 1, %s3488_s16  }
0x1c73   : >> { %2641 = vmax.xlane.f32.xlu0 %v2640_v9  ;;  %3199 = vmatpush3.msra.mxu0 %v3971_v57  ;;  %p2633_p8 = scmp.ge.s32.totalorder %s2634_s16, %s3982_s21 }
0x1d00   : >> { %v2642_v11 = vpop.xlane.xlu0 %2641 }
0x1d01   : >> { %v2643_v12 = vsub.f32 %v2638_v8, %v2642_v11 }
0x1d03   : >> { %v2644_v13 = vmul.f32 1.442695, %v2643_v12 }
0x1d05   : >> { %3360 = vpow2.f32 %v2644_v13 }
0x1d0f   : >> { %v3361_v14 = vpop.eup %3360 }
0x1d10   : >> { %3201 = vmatmul.mubr.msk.f32.vlgmr.msra.gmra.mrb[0].mxu0 %vm412_vm2, %v3361_v14 }
0x1de3   : >> { %v2715_v15 = vpop.f32.mrb[0].mxu0 }
0x1de4   : >> { %v2721_v16 = vmax.f32 %v2715_v15, 1e-30  ;;  %v3202_v17 = vpop.f32.mrb[1].mxu0 }
0x1de6   : >> { %3362 = vlog2.f32 %v2721_v16 }
0x1df0   : >> { %v3363_v18 = vpop.eup %3362 }
0x1df1   : >> { %v2723_v19 = vmul.f32 0.6931472, %v3363_v18  ;;  %2636 = sbr.rel (!%p2633_p8) target bundleno = 7281 (0x1c71), region = 100 }
0x1df3   : >> { %v2724_v21 = vadd.f32 %v2723_v19, %v2642_v11 }
0x1df5   : >> { %v2725_v22 = vadd.f32 %v2939_v20, %v2724_v21 }
0x1df7   : >> { %2726 = vst [vmem:[#allocation3] sm:$0x1] %v2725_v22 }
0x1df8 PF: > { %v2741_v33 = vstv %s2626_s19  ;;  %vm2743_vm13 = vcmask 0  }
0x1dfe   : > { %v2727_v23 = vld [vmem:[#allocation3] sm:$0x1] }
0x1dff   : > { %v2728_v24 = vadd.f32 %v2727_v23, %v3986_v32 }
0x1e01   : > { %v2729_v25 = vsel %vm2581_vm7, %v2728_v24, -inf }
0x1e02   : > { %2730 = vmax.xlane.f32.xlu0 %v2729_v25 }
0x1e8f   : > { %v2731_v26 = vpop.xlane.xlu0 %2730 }
0x1e90   : > { %v2732_v27 = vsub.f32 %v2728_v24, %v2731_v26 }
0x1e92   : > { %v2733_v28 = vmul.f32 1.442695, %v2732_v27 }
0x1e94   : > { %3364 = vpow2.f32 %v2733_v28 }
0x1e9e   : > { %v3365_v29 = vpop.eup %3364 }
0x1e9f   : > { %v2735_v30 = vsel %vm2581_vm7, %v3365_v29, 0.0 }
0x1ea0   : > { %2736 = vadd.xlane.f32.xlu0 %v2735_v30 }
0x1f2d   : > { %v2737_v31 = vpop.xlane.xlu0 %2736 }
0x1f2e   : > { %3366 = vlog2.f32 %v2737_v31 }
0x1f38   : > { %v3367_v57 = vpop.eup %3366 }
0x1f39   : > { %v2739_v34 = vmul.f32 0.6931472, %v3367_v57 }
0x1f3b   : > { %v2740_v36 = vadd.f32 %v2739_v34, %v2731_v26 }
0x1f3d   : > { %v2742_v32 = vsub.f32 %v2741_v33, %v2740_v36 }
0x1f3f   : > { %2744 = vst.msk [vmem:[%s312_s15] sm:$0x1] %vm2743_vm13, %v2742_v32 }
0x1f40 PF: > { %s25_s29 = sadd.s32 1, %s3484_s29  }
0x1f41   : > { %p22_p10 = scmp.ge.s32.totalorder %s25_s29, 4  }
0x1f43   :  { %24 = sbr.rel (!%p22_p10) target bundleno = 17 (0x11), region = 111 }
0x1f4a   :  { %2762 = vsyncpa [#allocation7], 1 }
0x1f4b   :  { %2764 = vsyncpa [#allocation7 + $0x1], 1 }
0x1f4c   :  { %2765 = vsyncpa [#allocation9], 1 }

</bundles_post_ra>
